<compile_context>
chip_gen: v7x
topology: tpu7x:2x2x1
jax: 0.10.0
libtpu: 0.0.40
codegen_flags: <defaults>
</compile_context>

<pallas_src>
import math

import jax
import jax.numpy as jnp
from jax.experimental import pallas as pl
from jax.experimental.pallas import tpu as pltpu

# ----------------------------- model hyper-parameters -----------------------------
D_MODEL = 32
NHEAD = 4
HEAD_DIM = D_MODEL // NHEAD
DIM_FF = 64
LN_EPS = 1e-5

_PARAM_ORDER = ("wqh", "bqh", "wkh", "bkh", "wvh", "bvh", "woh", "bo",
                "g2", "be2", "w1", "b1", "w2", "bf2", "g3", "be3")


# ----------------------------------- kernel ---------------------------------------
def _layernorm(x, gamma, beta):
    # One-pass mean / mean-of-squares: two independent lane reductions instead of two
    # dependent ones, then rsqrt (EUP).
    mu = jnp.mean(x, axis=-1, keepdims=True)
    ms = jnp.mean(x * x, axis=-1, keepdims=True)
    var = ms - mu * mu
    return (x - mu) * jax.lax.rsqrt(var + LN_EPS) * gamma + beta


def common_attention_kernel(
    q_ref, k_ref, v_ref,
    wqh_ref, bqh_ref, wkh_ref, bkh_ref, wvh_ref, bvh_ref,
    woh_ref, bo_ref,
    g2_ref, be2_ref,
    w1_ref, b1_ref, w2_ref, bf2_ref,
    g3_ref, be3_ref,
    out_ref,
):
    nb, t, e = q_ref.shape
    s = k_ref.shape[1]
    m = nb * t
    mk = nb * s

    # Flatten the batch block into one (NB*T, E) / (NB*S, E) slab for all row-wise work.
    q2 = q_ref[...].astype(jnp.float32).reshape(m, e)
    k2 = k_ref[...].astype(jnp.float32).reshape(mk, e)
    v2 = v_ref[...].astype(jnp.float32).reshape(mk, e)

    # --- multi-head attention: heads indexed on the leading dim of the weight refs ---
    attn = bo_ref[...].astype(jnp.float32)               # (1, E), broadcasts below
    for h in range(NHEAD):                                # static unroll, no lane slices
        qh = (jnp.dot(q2, wqh_ref[h], preferred_element_type=jnp.float32)
              + bqh_ref[h]).reshape(nb, t, HEAD_DIM)      # 1/sqrt(Dh) pre-folded into wq/bq
        kh = (jnp.dot(k2, wkh_ref[h], preferred_element_type=jnp.float32)
              + bkh_ref[h]).reshape(nb, s, HEAD_DIM)
        vh = (jnp.dot(v2, wvh_ref[h], preferred_element_type=jnp.float32)
              + bvh_ref[h]).reshape(nb, s, HEAD_DIM)

        sc = jnp.einsum("btd,bsd->bts", qh, kh,
                        preferred_element_type=jnp.float32)        # (NB, T, S)
        sc = sc - jnp.max(sc, axis=-1, keepdims=True)
        p = jnp.exp(sc)
        denom = jnp.sum(p, axis=-1, keepdims=True)
        inv = pl.reciprocal(denom, approx=True)                    # EUP
        inv = inv * (2.0 - denom * inv)                            # one Newton step (cheap, VPU)
        p = p * inv

        oh = jnp.einsum("bts,bsd->btd", p, vh,
                        preferred_element_type=jnp.float32).reshape(m, HEAD_DIM)
        # head merge folded into the output projection: attn += o_h @ Wo[h]
        attn = attn + jnp.dot(oh, woh_ref[h], preferred_element_type=jnp.float32)

    # --- residual + LayerNorm (norm2) ---
    out = _layernorm(q2 + attn, g2_ref[...], be2_ref[...])

    # --- feed-forward: linear2(relu(linear1(out))) ---
    h1 = jnp.dot(out, w1_ref[...], preferred_element_type=jnp.float32) + b1_ref[...]
    h1 = jnp.maximum(h1, 0.0)
    ff = jnp.dot(h1, w2_ref[...], preferred_element_type=jnp.float32) + bf2_ref[...]

    # --- residual + LayerNorm (norm3) ---
    out = _layernorm(out + ff, g3_ref[...], be3_ref[...])

    out_ref[...] = out.reshape(nb, t, e).astype(out_ref.dtype)


# ----------------------------------- wrapper ---------------------------------------
def _full_spec(shape):
    nd = len(shape)

    def idx(n):
        return (0,) * nd

    return pl.BlockSpec(shape, idx)


def _pick_batch_block(n, max_block=64):
    """Largest divisor of n <= max_block; keep >=2 grid steps when possible (v7x: 2 TCs)."""
    def largest_divisor(n, cap):
        cap = max(1, min(cap, n))
        for d in range(cap, 0, -1):
            if n % d == 0:
                return d
        return 1

    nb = largest_divisor(n, max_block)
    if nb == n and n > 1:
        nb = largest_divisor(n, n // 2)
    return nb


def _prepare_params(params):
    """Pre-split weights per head (free, tiny, done in the wrapper) and fold in the scale."""
    e = D_MODEL
    scale = 1.0 / math.sqrt(HEAD_DIM)

    def w_heads(w):  # (E, E) -> (H, E, Dh)
        return w.reshape(e, NHEAD, HEAD_DIM).transpose(1, 0, 2)

    def b_heads(b):  # (1, E) -> (H, 1, Dh)
        return b.reshape(NHEAD, HEAD_DIM)[:, None, :]

    return {
        "wqh": w_heads(params["wq"] * scale),
        "bqh": b_heads(params["bq"] * scale),
        "wkh": w_heads(params["wk"]),
        "bkh": b_heads(params["bk"]),
        "wvh": w_heads(params["wv"]),
        "bvh": b_heads(params["bv"]),
        "woh": params["wo"].reshape(NHEAD, HEAD_DIM, e),
        "bo": params["bo"].reshape(1, e),
        "g2": params["g2"].reshape(1, e), "be2": params["be2"].reshape(1, e),
        "w1": params["w1"], "b1": params["b1"].reshape(1, DIM_FF),
        "w2": params["w2"], "bf2": params["bf2"].reshape(1, e),
        "g3": params["g3"].reshape(1, e), "be3": params["be3"].reshape(1, e),
    }


def common_attention_layer_batch_first(q, k, v, params, batch_block=None):
    """Transpose-free entry point.  q: (N, T, E); k/v: (N, S, E)."""
    n, t, e = q.shape
    s = k.shape[1]
    nb = batch_block if batch_block is not None else _pick_batch_block(n)
    assert n % nb == 0, "batch_block must divide the batch size"
    p = _prepare_params(params)

    in_specs = [
        pl.BlockSpec((nb, t, e), lambda i: (i, 0, 0)),   # q
        pl.BlockSpec((nb, s, e), lambda i: (i, 0, 0)),   # k
        pl.BlockSpec((nb, s, e), lambda i: (i, 0, 0)),   # v
    ] + [_full_spec(tuple(p[name].shape)) for name in _PARAM_ORDER]

    out = pl.pallas_call(
        common_attention_kernel,
        out_shape=jax.ShapeDtypeStruct((n, t, e), q.dtype),
        grid_spec=pltpu.PrefetchScalarGridSpec(
            num_scalar_prefetch=0,
            grid=(n // nb,),
            in_specs=in_specs,
            out_specs=pl.BlockSpec((nb, t, e), lambda i: (i, 0, 0)),
        ),
        compiler_params=pltpu.CompilerParams(
            dimension_semantics=("parallel",)),
    )(q, k, v, *[p[name] for name in _PARAM_ORDER])
    return out


def common_attention_layer(query, key, value, params, batch_block=None):
    """PyTorch MultiheadAttention layout shim: query (T, N, E), key/value (S, N, E).
    Prefer common_attention_layer_batch_first to avoid the boundary transposes."""
    q = jnp.transpose(query, (1, 0, 2))
    k = jnp.transpose(key, (1, 0, 2))
    v = jnp.transpose(value, (1, 0, 2))
    out = common_attention_layer_batch_first(q, k, v, params, batch_block)
    return jnp.transpose(out, (1, 0, 2))


# ------------------------------ pure-JAX reference ---------------------------------
def reference_batch_first(q, k, v, p):
    n, t, e = q.shape
    s = k.shape[1]
    qf = q.astype(jnp.float32)
    kf = k.astype(jnp.float32)
    vf = v.astype(jnp.float32)

    qp = qf @ p["wq"] + p["bq"]
    kp = kf @ p["wk"] + p["bk"]
    vp = vf @ p["wv"] + p["bv"]

    def split(x, ln):
        return x.reshape(n, ln, NHEAD, HEAD_DIM).transpose(0, 2, 1, 3)  # (N,H,L,Dh)

    qh, kh, vh = split(qp, t), split(kp, s), split(vp, s)
    sc = jnp.einsum("nhtd,nhsd->nhts", qh * (1.0 / math.sqrt(HEAD_DIM)), kh)
    pr = jax.nn.softmax(sc, axis=-1)
    attn = jnp.einsum("nhts,nhsd->nhtd", pr, vh).transpose(0, 2, 1, 3).reshape(n, t, e)
    attn = attn @ p["wo"] + p["bo"]

    def ln_(x, g, b):
        mu = jnp.mean(x, -1, keepdims=True)
        var = jnp.mean((x - mu) ** 2, -1, keepdims=True)
        return (x - mu) / jnp.sqrt(var + LN_EPS) * g + b

    out = ln_(qf + attn, p["g2"], p["be2"])
    ff = jnp.maximum(out @ p["w1"] + p["b1"], 0.0) @ p["w2"] + p["bf2"]
    out = ln_(out + ff, p["g3"], p["be3"])
    return out


# ------------------------------------- main ----------------------------------------
def make_params(key):
    keys = jax.random.split(key, 8)
    u = lambda k, shape, fan: (jax.random.uniform(k, shape, jnp.float32, -1.0, 1.0)
                               / math.sqrt(fan))
    return {
        "wq": u(keys[0], (D_MODEL, D_MODEL), D_MODEL),
        "wk": u(keys[1], (D_MODEL, D_MODEL), D_MODEL),
        "wv": u(keys[2], (D_MODEL, D_MODEL), D_MODEL),
        "wo": u(keys[3], (D_MODEL, D_MODEL), D_MODEL),
        "bq": jnp.zeros((1, D_MODEL), jnp.float32),
        "bk": jnp.zeros((1, D_MODEL), jnp.float32),
        "bv": jnp.zeros((1, D_MODEL), jnp.float32),
        "bo": u(keys[4], (1, D_MODEL), D_MODEL),
        "w1": u(keys[5], (D_MODEL, DIM_FF), D_MODEL),
        "b1": u(keys[6], (1, DIM_FF), D_MODEL),
        "w2": u(keys[7], (DIM_FF, D_MODEL), DIM_FF),
        "bf2": jnp.full((1, D_MODEL), 0.01, jnp.float32),
        "g2": jnp.ones((1, D_MODEL), jnp.float32),
        "be2": jnp.zeros((1, D_MODEL), jnp.float32),
        "g3": jnp.ones((1, D_MODEL), jnp.float32),
        "be3": jnp.zeros((1, D_MODEL), jnp.float32),
    }


if __name__ == "__main__":
    N, T, S = 8, 8, 8
    root = jax.random.PRNGKey(0)
    kq, kk, kv, kp = jax.random.split(root, 4)

    # batch-first inputs (transpose-free fast path); the seq-first shim is also available.
    q = jax.random.normal(kq, (N, T, D_MODEL), jnp.float32)
    k = jax.random.normal(kk, (N, S, D_MODEL), jnp.float32)
    v = jax.random.normal(kv, (N, S, D_MODEL), jnp.float32)
    params = make_params(kp)

    out = common_attention_layer_batch_first(q, k, v, params)   # grid=(2,), NB=4 -> 32-row slabs
    out = jax.block_until_ready(out)

    ref = reference_batch_first(q, k, v, params)
    assert out.shape == (N, T, D_MODEL)
    max_err = float(jnp.max(jnp.abs(out - ref)))
    assert jnp.allclose(out, ref, atol=1e-3, rtol=1e-3), max_err

    print("KERNEL_OK")
</pallas_src>

<mosaic_0001>
module attributes {stable_mosaic.version = 11 : i64} {
  func.func @common_attention_kernel(%arg0: i32, %arg1: memref<4x8x32xf32, #tpu.memory_space<vmem>>, %arg2: memref<4x8x32xf32, #tpu.memory_space<vmem>>, %arg3: memref<4x8x32xf32, #tpu.memory_space<vmem>>, %arg4: memref<4x32x8xf32, #tpu.memory_space<vmem>>, %arg5: memref<4x1x8xf32, #tpu.memory_space<vmem>>, %arg6: memref<4x32x8xf32, #tpu.memory_space<vmem>>, %arg7: memref<4x1x8xf32, #tpu.memory_space<vmem>>, %arg8: memref<4x32x8xf32, #tpu.memory_space<vmem>>, %arg9: memref<4x1x8xf32, #tpu.memory_space<vmem>>, %arg10: memref<4x8x32xf32, #tpu.memory_space<vmem>>, %arg11: memref<1x32xf32, #tpu.memory_space<vmem>>, %arg12: memref<1x32xf32, #tpu.memory_space<vmem>>, %arg13: memref<1x32xf32, #tpu.memory_space<vmem>>, %arg14: memref<32x64xf32, #tpu.memory_space<vmem>>, %arg15: memref<1x64xf32, #tpu.memory_space<vmem>>, %arg16: memref<64x32xf32, #tpu.memory_space<vmem>>, %arg17: memref<1x32xf32, #tpu.memory_space<vmem>>, %arg18: memref<1x32xf32, #tpu.memory_space<vmem>>, %arg19: memref<1x32xf32, #tpu.memory_space<vmem>>, %arg20: memref<4x8x32xf32, #tpu.memory_space<vmem>>) attributes {dimension_semantics = [#tpu.dimension_semantics<parallel>], iteration_bounds = array<i64: 2>, scalar_prefetch = 0 : i64, scratch_operands = 0 : i64, tpu.core_type = #tpu.core_type<tc>, window_params = [{transform_indices = @transform_0, window_bounds = array<i64: 4, 8, 32>}, {transform_indices = @transform_1, window_bounds = array<i64: 4, 8, 32>}, {transform_indices = @transform_2, window_bounds = array<i64: 4, 8, 32>}, {pipeline_mode = #tpu.pipeline_mode<synchronous>, transform_indices = @transform_3, window_bounds = array<i64: 4, 32, 8>}, {pipeline_mode = #tpu.pipeline_mode<synchronous>, transform_indices = @transform_4, window_bounds = array<i64: 4, 1, 8>}, {pipeline_mode = #tpu.pipeline_mode<synchronous>, transform_indices = @transform_5, window_bounds = array<i64: 4, 32, 8>}, {pipeline_mode = #tpu.pipeline_mode<synchronous>, transform_indices = @transform_6, window_bounds = array<i64: 4, 1, 8>}, {pipeline_mode = #tpu.pipeline_mode<synchronous>, transform_indices = @transform_7, window_bounds = array<i64: 4, 32, 8>}, {pipeline_mode = #tpu.pipeline_mode<synchronous>, transform_indices = @transform_8, window_bounds = array<i64: 4, 1, 8>}, {pipeline_mode = #tpu.pipeline_mode<synchronous>, transform_indices = @transform_9, window_bounds = array<i64: 4, 8, 32>}, {pipeline_mode = #tpu.pipeline_mode<synchronous>, transform_indices = @transform_10, window_bounds = array<i64: 1, 32>}, {pipeline_mode = #tpu.pipeline_mode<synchronous>, transform_indices = @transform_11, window_bounds = array<i64: 1, 32>}, {pipeline_mode = #tpu.pipeline_mode<synchronous>, transform_indices = @transform_12, window_bounds = array<i64: 1, 32>}, {pipeline_mode = #tpu.pipeline_mode<synchronous>, transform_indices = @transform_13, window_bounds = array<i64: 32, 64>}, {pipeline_mode = #tpu.pipeline_mode<synchronous>, transform_indices = @transform_14, window_bounds = array<i64: 1, 64>}, {pipeline_mode = #tpu.pipeline_mode<synchronous>, transform_indices = @transform_15, window_bounds = array<i64: 64, 32>}, {pipeline_mode = #tpu.pipeline_mode<synchronous>, transform_indices = @transform_16, window_bounds = array<i64: 1, 32>}, {pipeline_mode = #tpu.pipeline_mode<synchronous>, transform_indices = @transform_17, window_bounds = array<i64: 1, 32>}, {pipeline_mode = #tpu.pipeline_mode<synchronous>, transform_indices = @transform_18, window_bounds = array<i64: 1, 32>}, {transform_indices = @transform_19, window_bounds = array<i64: 4, 8, 32>}]} {
    %c0 = arith.constant 0 : index
    %c0_0 = arith.constant 0 : index
    %c0_1 = arith.constant 0 : index
    %0 = vector.load %arg1[%c0, %c0_0, %c0_1] : memref<4x8x32xf32, #tpu.memory_space<vmem>>, vector<4x8x32xf32>
    %1 = vector.shape_cast %0 : vector<4x8x32xf32> to vector<32x32xf32>
    %c0_2 = arith.constant 0 : index
    %c0_3 = arith.constant 0 : index
    %c0_4 = arith.constant 0 : index
    %2 = vector.load %arg2[%c0_2, %c0_3, %c0_4] : memref<4x8x32xf32, #tpu.memory_space<vmem>>, vector<4x8x32xf32>
    %3 = vector.shape_cast %2 : vector<4x8x32xf32> to vector<32x32xf32>
    %c0_5 = arith.constant 0 : index
    %c0_6 = arith.constant 0 : index
    %c0_7 = arith.constant 0 : index
    %4 = vector.load %arg3[%c0_5, %c0_6, %c0_7] : memref<4x8x32xf32, #tpu.memory_space<vmem>>, vector<4x8x32xf32>
    %5 = vector.shape_cast %4 : vector<4x8x32xf32> to vector<32x32xf32>
    %c0_8 = arith.constant 0 : index
    %c0_9 = arith.constant 0 : index
    %6 = vector.load %arg11[%c0_8, %c0_9] : memref<1x32xf32, #tpu.memory_space<vmem>>, vector<1x32xf32>
    %c0_10 = arith.constant 0 : index
    %c0_11 = arith.constant 0 : index
    %c0_12 = arith.constant 0 : index
    %7 = vector.load %arg4[%c0_10, %c0_11, %c0_12] : memref<4x32x8xf32, #tpu.memory_space<vmem>>, vector<1x32x8xf32>
    %8 = vector.shape_cast %7 : vector<1x32x8xf32> to vector<32x8xf32>
    %cst = arith.constant dense<0.000000e+00> : vector<32x8xf32>
    %9 = tpu.matmul %1, %8, %cst {dimension_numbers = #tpu.dot_dimension_numbers<[1], [0], [0], [1], [0, 0, 1, 1], [], []>} : vector<32x32xf32>, vector<32x8xf32>, vector<32x8xf32> -> vector<32x8xf32>
    %c0_13 = arith.constant 0 : index
    %c0_14 = arith.constant 0 : index
    %c0_15 = arith.constant 0 : index
    %10 = vector.load %arg5[%c0_13, %c0_14, %c0_15] : memref<4x1x8xf32, #tpu.memory_space<vmem>>, vector<1x1x8xf32>
    %11 = vector.shape_cast %10 : vector<1x1x8xf32> to vector<1x8xf32>
    %12 = vector.broadcast %11 : vector<1x8xf32> to vector<32x8xf32>
    %13 = arith.addf %9, %12 : vector<32x8xf32>
    %14 = vector.shape_cast %13 : vector<32x8xf32> to vector<4x8x8xf32>
    %c0_16 = arith.constant 0 : index
    %c0_17 = arith.constant 0 : index
    %c0_18 = arith.constant 0 : index
    %15 = vector.load %arg6[%c0_16, %c0_17, %c0_18] : memref<4x32x8xf32, #tpu.memory_space<vmem>>, vector<1x32x8xf32>
    %16 = vector.shape_cast %15 : vector<1x32x8xf32> to vector<32x8xf32>
    %cst_19 = arith.constant dense<0.000000e+00> : vector<32x8xf32>
    %17 = tpu.matmul %3, %16, %cst_19 {dimension_numbers = #tpu.dot_dimension_numbers<[1], [0], [0], [1], [0, 0, 1, 1], [], []>} : vector<32x32xf32>, vector<32x8xf32>, vector<32x8xf32> -> vector<32x8xf32>
    %c0_20 = arith.constant 0 : index
    %c0_21 = arith.constant 0 : index
    %c0_22 = arith.constant 0 : index
    %18 = vector.load %arg7[%c0_20, %c0_21, %c0_22] : memref<4x1x8xf32, #tpu.memory_space<vmem>>, vector<1x1x8xf32>
    %19 = vector.shape_cast %18 : vector<1x1x8xf32> to vector<1x8xf32>
    %20 = vector.broadcast %19 : vector<1x8xf32> to vector<32x8xf32>
    %21 = arith.addf %17, %20 : vector<32x8xf32>
    %22 = vector.shape_cast %21 : vector<32x8xf32> to vector<4x8x8xf32>
    %c0_23 = arith.constant 0 : index
    %c0_24 = arith.constant 0 : index
    %c0_25 = arith.constant 0 : index
    %23 = vector.load %arg8[%c0_23, %c0_24, %c0_25] : memref<4x32x8xf32, #tpu.memory_space<vmem>>, vector<1x32x8xf32>
    %24 = vector.shape_cast %23 : vector<1x32x8xf32> to vector<32x8xf32>
    %cst_26 = arith.constant dense<0.000000e+00> : vector<32x8xf32>
    %25 = tpu.matmul %5, %24, %cst_26 {dimension_numbers = #tpu.dot_dimension_numbers<[1], [0], [0], [1], [0, 0, 1, 1], [], []>} : vector<32x32xf32>, vector<32x8xf32>, vector<32x8xf32> -> vector<32x8xf32>
    %c0_27 = arith.constant 0 : index
    %c0_28 = arith.constant 0 : index
    %c0_29 = arith.constant 0 : index
    %26 = vector.load %arg9[%c0_27, %c0_28, %c0_29] : memref<4x1x8xf32, #tpu.memory_space<vmem>>, vector<1x1x8xf32>
    %27 = vector.shape_cast %26 : vector<1x1x8xf32> to vector<1x8xf32>
    %28 = vector.broadcast %27 : vector<1x8xf32> to vector<32x8xf32>
    %29 = arith.addf %25, %28 : vector<32x8xf32>
    %30 = vector.shape_cast %29 : vector<32x8xf32> to vector<4x8x8xf32>
    "tpu.trace_start"() <{level = 10 : i32, message = "btd,bsd->bts"}> : () -> ()
    %cst_30 = arith.constant dense<0.000000e+00> : vector<4x8x8xf32>
    %31 = tpu.matmul %14, %22, %cst_30 {dimension_numbers = #tpu.dot_dimension_numbers<[2], [2], [1], [1], [0, 0, 0, 1, 1, 1], [0], [0]>} : vector<4x8x8xf32>, vector<4x8x8xf32>, vector<4x8x8xf32> -> vector<4x8x8xf32>
    "tpu.trace_stop"() : () -> ()
    %cst_31 = arith.constant dense<0xFF800000> : vector<4x8xf32>
    %32 = vector.multi_reduction <maximumf>, %31, %cst_31 [2] : vector<4x8x8xf32> to vector<4x8xf32>
    %33 = vector.shape_cast %32 : vector<4x8xf32> to vector<4x8x1xf32>
    %34 = vector.broadcast %33 : vector<4x8x1xf32> to vector<4x8x8xf32>
    %35 = arith.subf %31, %34 : vector<4x8x8xf32>
    %36 = math.exp %35 : vector<4x8x8xf32>
    %cst_32 = arith.constant dense<0.000000e+00> : vector<4x8xf32>
    %37 = vector.multi_reduction <add>, %36, %cst_32 [2] : vector<4x8x8xf32> to vector<4x8xf32>
    %38 = vector.shape_cast %37 : vector<4x8xf32> to vector<4x8x1xf32>
    %39 = tpu.reciprocal %38 {approx = true} : vector<4x8x1xf32> -> vector<4x8x1xf32>
    %40 = arith.mulf %38, %39 : vector<4x8x1xf32>
    %cst_33 = arith.constant 2.000000e+00 : f32
    %41 = vector.broadcast %cst_33 : f32 to vector<4x8x1xf32>
    %42 = arith.subf %41, %40 : vector<4x8x1xf32>
    %43 = arith.mulf %39, %42 : vector<4x8x1xf32>
    %44 = vector.broadcast %43 : vector<4x8x1xf32> to vector<4x8x8xf32>
    %45 = arith.mulf %36, %44 : vector<4x8x8xf32>
    "tpu.trace_start"() <{level = 10 : i32, message = "bts,bsd->btd"}> : () -> ()
    %cst_34 = arith.constant dense<0.000000e+00> : vector<4x8x8xf32>
    %46 = tpu.matmul %45, %30, %cst_34 {dimension_numbers = #tpu.dot_dimension_numbers<[2], [1], [1], [2], [0, 0, 0, 1, 1, 2], [0], [0]>} : vector<4x8x8xf32>, vector<4x8x8xf32>, vector<4x8x8xf32> -> vector<4x8x8xf32>
    "tpu.trace_stop"() : () -> ()
    %47 = vector.shape_cast %46 : vector<4x8x8xf32> to vector<32x8xf32>
    %c0_35 = arith.constant 0 : index
    %c0_36 = arith.constant 0 : index
    %c0_37 = arith.constant 0 : index
    %48 = vector.load %arg10[%c0_35, %c0_36, %c0_37] : memref<4x8x32xf32, #tpu.memory_space<vmem>>, vector<1x8x32xf32>
    %49 = vector.shape_cast %48 : vector<1x8x32xf32> to vector<8x32xf32>
    %cst_38 = arith.constant dense<0.000000e+00> : vector<32x32xf32>
    %50 = tpu.matmul %47, %49, %cst_38 {dimension_numbers = #tpu.dot_dimension_numbers<[1], [0], [0], [1], [0, 0, 1, 1], [], []>} : vector<32x8xf32>, vector<8x32xf32>, vector<32x32xf32> -> vector<32x32xf32>
    %51 = vector.broadcast %6 : vector<1x32xf32> to vector<32x32xf32>
    %52 = arith.addf %51, %50 : vector<32x32xf32>
    %c1 = arith.constant 1 : index
    %c0_39 = arith.constant 0 : index
    %c0_40 = arith.constant 0 : index
    %53 = vector.load %arg4[%c1, %c0_39, %c0_40] : memref<4x32x8xf32, #tpu.memory_space<vmem>>, vector<1x32x8xf32>
    %54 = vector.shape_cast %53 : vector<1x32x8xf32> to vector<32x8xf32>
    %cst_41 = arith.constant dense<0.000000e+00> : vector<32x8xf32>
    %55 = tpu.matmul %1, %54, %cst_41 {dimension_numbers = #tpu.dot_dimension_numbers<[1], [0], [0], [1], [0, 0, 1, 1], [], []>} : vector<32x32xf32>, vector<32x8xf32>, vector<32x8xf32> -> vector<32x8xf32>
    %c1_42 = arith.constant 1 : index
    %c0_43 = arith.constant 0 : index
    %c0_44 = arith.constant 0 : index
    %56 = vector.load %arg5[%c1_42, %c0_43, %c0_44] : memref<4x1x8xf32, #tpu.memory_space<vmem>>, vector<1x1x8xf32>
    %57 = vector.shape_cast %56 : vector<1x1x8xf32> to vector<1x8xf32>
    %58 = vector.broadcast %57 : vector<1x8xf32> to vector<32x8xf32>
    %59 = arith.addf %55, %58 : vector<32x8xf32>
    %60 = vector.shape_cast %59 : vector<32x8xf32> to vector<4x8x8xf32>
    %c1_45 = arith.constant 1 : index
    %c0_46 = arith.constant 0 : index
    %c0_47 = arith.constant 0 : index
    %61 = vector.load %arg6[%c1_45, %c0_46, %c0_47] : memref<4x32x8xf32, #tpu.memory_space<vmem>>, vector<1x32x8xf32>
    %62 = vector.shape_cast %61 : vector<1x32x8xf32> to vector<32x8xf32>
    %cst_48 = arith.constant dense<0.000000e+00> : vector<32x8xf32>
    %63 = tpu.matmul %3, %62, %cst_48 {dimension_numbers = #tpu.dot_dimension_numbers<[1], [0], [0], [1], [0, 0, 1, 1], [], []>} : vector<32x32xf32>, vector<32x8xf32>, vector<32x8xf32> -> vector<32x8xf32>
    %c1_49 = arith.constant 1 : index
    %c0_50 = arith.constant 0 : index
    %c0_51 = arith.constant 0 : index
    %64 = vector.load %arg7[%c1_49, %c0_50, %c0_51] : memref<4x1x8xf32, #tpu.memory_space<vmem>>, vector<1x1x8xf32>
    %65 = vector.shape_cast %64 : vector<1x1x8xf32> to vector<1x8xf32>
    %66 = vector.broadcast %65 : vector<1x8xf32> to vector<32x8xf32>
    %67 = arith.addf %63, %66 : vector<32x8xf32>
    %68 = vector.shape_cast %67 : vector<32x8xf32> to vector<4x8x8xf32>
    %c1_52 = arith.constant 1 : index
    %c0_53 = arith.constant 0 : index
    %c0_54 = arith.constant 0 : index
    %69 = vector.load %arg8[%c1_52, %c0_53, %c0_54] : memref<4x32x8xf32, #tpu.memory_space<vmem>>, vector<1x32x8xf32>
    %70 = vector.shape_cast %69 : vector<1x32x8xf32> to vector<32x8xf32>
    %cst_55 = arith.constant dense<0.000000e+00> : vector<32x8xf32>
    %71 = tpu.matmul %5, %70, %cst_55 {dimension_numbers = #tpu.dot_dimension_numbers<[1], [0], [0], [1], [0, 0, 1, 1], [], []>} : vector<32x32xf32>, vector<32x8xf32>, vector<32x8xf32> -> vector<32x8xf32>
    %c1_56 = arith.constant 1 : index
    %c0_57 = arith.constant 0 : index
    %c0_58 = arith.constant 0 : index
    %72 = vector.load %arg9[%c1_56, %c0_57, %c0_58] : memref<4x1x8xf32, #tpu.memory_space<vmem>>, vector<1x1x8xf32>
    %73 = vector.shape_cast %72 : vector<1x1x8xf32> to vector<1x8xf32>
    %74 = vector.broadcast %73 : vector<1x8xf32> to vector<32x8xf32>
    %75 = arith.addf %71, %74 : vector<32x8xf32>
    %76 = vector.shape_cast %75 : vector<32x8xf32> to vector<4x8x8xf32>
    "tpu.trace_start"() <{level = 10 : i32, message = "btd,bsd->bts"}> : () -> ()
    %cst_59 = arith.constant dense<0.000000e+00> : vector<4x8x8xf32>
    %77 = tpu.matmul %60, %68, %cst_59 {dimension_numbers = #tpu.dot_dimension_numbers<[2], [2], [1], [1], [0, 0, 0, 1, 1, 1], [0], [0]>} : vector<4x8x8xf32>, vector<4x8x8xf32>, vector<4x8x8xf32> -> vector<4x8x8xf32>
    "tpu.trace_stop"() : () -> ()
    %cst_60 = arith.constant dense<0xFF800000> : vector<4x8xf32>
    %78 = vector.multi_reduction <maximumf>, %77, %cst_60 [2] : vector<4x8x8xf32> to vector<4x8xf32>
    %79 = vector.shape_cast %78 : vector<4x8xf32> to vector<4x8x1xf32>
    %80 = vector.broadcast %79 : vector<4x8x1xf32> to vector<4x8x8xf32>
    %81 = arith.subf %77, %80 : vector<4x8x8xf32>
    %82 = math.exp %81 : vector<4x8x8xf32>
    %cst_61 = arith.constant dense<0.000000e+00> : vector<4x8xf32>
    %83 = vector.multi_reduction <add>, %82, %cst_61 [2] : vector<4x8x8xf32> to vector<4x8xf32>
    %84 = vector.shape_cast %83 : vector<4x8xf32> to vector<4x8x1xf32>
    %85 = tpu.reciprocal %84 {approx = true} : vector<4x8x1xf32> -> vector<4x8x1xf32>
    %86 = arith.mulf %84, %85 : vector<4x8x1xf32>
    %cst_62 = arith.constant 2.000000e+00 : f32
    %87 = vector.broadcast %cst_62 : f32 to vector<4x8x1xf32>
    %88 = arith.subf %87, %86 : vector<4x8x1xf32>
    %89 = arith.mulf %85, %88 : vector<4x8x1xf32>
    %90 = vector.broadcast %89 : vector<4x8x1xf32> to vector<4x8x8xf32>
    %91 = arith.mulf %82, %90 : vector<4x8x8xf32>
    "tpu.trace_start"() <{level = 10 : i32, message = "bts,bsd->btd"}> : () -> ()
    %cst_63 = arith.constant dense<0.000000e+00> : vector<4x8x8xf32>
    %92 = tpu.matmul %91, %76, %cst_63 {dimension_numbers = #tpu.dot_dimension_numbers<[2], [1], [1], [2], [0, 0, 0, 1, 1, 2], [0], [0]>} : vector<4x8x8xf32>, vector<4x8x8xf32>, vector<4x8x8xf32> -> vector<4x8x8xf32>
    "tpu.trace_stop"() : () -> ()
    %93 = vector.shape_cast %92 : vector<4x8x8xf32> to vector<32x8xf32>
    %c1_64 = arith.constant 1 : index
    %c0_65 = arith.constant 0 : index
    %c0_66 = arith.constant 0 : index
    %94 = vector.load %arg10[%c1_64, %c0_65, %c0_66] : memref<4x8x32xf32, #tpu.memory_space<vmem>>, vector<1x8x32xf32>
    %95 = vector.shape_cast %94 : vector<1x8x32xf32> to vector<8x32xf32>
    %cst_67 = arith.constant dense<0.000000e+00> : vector<32x32xf32>
    %96 = tpu.matmul %93, %95, %cst_67 {dimension_numbers = #tpu.dot_dimension_numbers<[1], [0], [0], [1], [0, 0, 1, 1], [], []>} : vector<32x8xf32>, vector<8x32xf32>, vector<32x32xf32> -> vector<32x32xf32>
    %97 = arith.addf %52, %96 : vector<32x32xf32>
    %c2 = arith.constant 2 : index
    %c0_68 = arith.constant 0 : index
    %c0_69 = arith.constant 0 : index
    %98 = vector.load %arg4[%c2, %c0_68, %c0_69] : memref<4x32x8xf32, #tpu.memory_space<vmem>>, vector<1x32x8xf32>
    %99 = vector.shape_cast %98 : vector<1x32x8xf32> to vector<32x8xf32>
    %cst_70 = arith.constant dense<0.000000e+00> : vector<32x8xf32>
    %100 = tpu.matmul %1, %99, %cst_70 {dimension_numbers = #tpu.dot_dimension_numbers<[1], [0], [0], [1], [0, 0, 1, 1], [], []>} : vector<32x32xf32>, vector<32x8xf32>, vector<32x8xf32> -> vector<32x8xf32>
    %c2_71 = arith.constant 2 : index
    %c0_72 = arith.constant 0 : index
    %c0_73 = arith.constant 0 : index
    %101 = vector.load %arg5[%c2_71, %c0_72, %c0_73] : memref<4x1x8xf32, #tpu.memory_space<vmem>>, vector<1x1x8xf32>
    %102 = vector.shape_cast %101 : vector<1x1x8xf32> to vector<1x8xf32>
    %103 = vector.broadcast %102 : vector<1x8xf32> to vector<32x8xf32>
    %104 = arith.addf %100, %103 : vector<32x8xf32>
    %105 = vector.shape_cast %104 : vector<32x8xf32> to vector<4x8x8xf32>
    %c2_74 = arith.constant 2 : index
    %c0_75 = arith.constant 0 : index
    %c0_76 = arith.constant 0 : index
    %106 = vector.load %arg6[%c2_74, %c0_75, %c0_76] : memref<4x32x8xf32, #tpu.memory_space<vmem>>, vector<1x32x8xf32>
    %107 = vector.shape_cast %106 : vector<1x32x8xf32> to vector<32x8xf32>
    %cst_77 = arith.constant dense<0.000000e+00> : vector<32x8xf32>
    %108 = tpu.matmul %3, %107, %cst_77 {dimension_numbers = #tpu.dot_dimension_numbers<[1], [0], [0], [1], [0, 0, 1, 1], [], []>} : vector<32x32xf32>, vector<32x8xf32>, vector<32x8xf32> -> vector<32x8xf32>
    %c2_78 = arith.constant 2 : index
    %c0_79 = arith.constant 0 : index
    %c0_80 = arith.constant 0 : index
    %109 = vector.load %arg7[%c2_78, %c0_79, %c0_80] : memref<4x1x8xf32, #tpu.memory_space<vmem>>, vector<1x1x8xf32>
    %110 = vector.shape_cast %109 : vector<1x1x8xf32> to vector<1x8xf32>
    %111 = vector.broadcast %110 : vector<1x8xf32> to vector<32x8xf32>
    %112 = arith.addf %108, %111 : vector<32x8xf32>
    %113 = vector.shape_cast %112 : vector<32x8xf32> to vector<4x8x8xf32>
    %c2_81 = arith.constant 2 : index
    %c0_82 = arith.constant 0 : index
    %c0_83 = arith.constant 0 : index
    %114 = vector.load %arg8[%c2_81, %c0_82, %c0_83] : memref<4x32x8xf32, #tpu.memory_space<vmem>>, vector<1x32x8xf32>
    %115 = vector.shape_cast %114 : vector<1x32x8xf32> to vector<32x8xf32>
    %cst_84 = arith.constant dense<0.000000e+00> : vector<32x8xf32>
    %116 = tpu.matmul %5, %115, %cst_84 {dimension_numbers = #tpu.dot_dimension_numbers<[1], [0], [0], [1], [0, 0, 1, 1], [], []>} : vector<32x32xf32>, vector<32x8xf32>, vector<32x8xf32> -> vector<32x8xf32>
    %c2_85 = arith.constant 2 : index
    %c0_86 = arith.constant 0 : index
    %c0_87 = arith.constant 0 : index
    %117 = vector.load %arg9[%c2_85, %c0_86, %c0_87] : memref<4x1x8xf32, #tpu.memory_space<vmem>>, vector<1x1x8xf32>
    %118 = vector.shape_cast %117 : vector<1x1x8xf32> to vector<1x8xf32>
    %119 = vector.broadcast %118 : vector<1x8xf32> to vector<32x8xf32>
    %120 = arith.addf %116, %119 : vector<32x8xf32>
    %121 = vector.shape_cast %120 : vector<32x8xf32> to vector<4x8x8xf32>
    "tpu.trace_start"() <{level = 10 : i32, message = "btd,bsd->bts"}> : () -> ()
    %cst_88 = arith.constant dense<0.000000e+00> : vector<4x8x8xf32>
    %122 = tpu.matmul %105, %113, %cst_88 {dimension_numbers = #tpu.dot_dimension_numbers<[2], [2], [1], [1], [0, 0, 0, 1, 1, 1], [0], [0]>} : vector<4x8x8xf32>, vector<4x8x8xf32>, vector<4x8x8xf32> -> vector<4x8x8xf32>
    "tpu.trace_stop"() : () -> ()
    %cst_89 = arith.constant dense<0xFF800000> : vector<4x8xf32>
    %123 = vector.multi_reduction <maximumf>, %122, %cst_89 [2] : vector<4x8x8xf32> to vector<4x8xf32>
    %124 = vector.shape_cast %123 : vector<4x8xf32> to vector<4x8x1xf32>
    %125 = vector.broadcast %124 : vector<4x8x1xf32> to vector<4x8x8xf32>
    %126 = arith.subf %122, %125 : vector<4x8x8xf32>
    %127 = math.exp %126 : vector<4x8x8xf32>
    %cst_90 = arith.constant dense<0.000000e+00> : vector<4x8xf32>
    %128 = vector.multi_reduction <add>, %127, %cst_90 [2] : vector<4x8x8xf32> to vector<4x8xf32>
    %129 = vector.shape_cast %128 : vector<4x8xf32> to vector<4x8x1xf32>
    %130 = tpu.reciprocal %129 {approx = true} : vector<4x8x1xf32> -> vector<4x8x1xf32>
    %131 = arith.mulf %129, %130 : vector<4x8x1xf32>
    %cst_91 = arith.constant 2.000000e+00 : f32
    %132 = vector.broadcast %cst_91 : f32 to vector<4x8x1xf32>
    %133 = arith.subf %132, %131 : vector<4x8x1xf32>
    %134 = arith.mulf %130, %133 : vector<4x8x1xf32>
    %135 = vector.broadcast %134 : vector<4x8x1xf32> to vector<4x8x8xf32>
    %136 = arith.mulf %127, %135 : vector<4x8x8xf32>
    "tpu.trace_start"() <{level = 10 : i32, message = "bts,bsd->btd"}> : () -> ()
    %cst_92 = arith.constant dense<0.000000e+00> : vector<4x8x8xf32>
    %137 = tpu.matmul %136, %121, %cst_92 {dimension_numbers = #tpu.dot_dimension_numbers<[2], [1], [1], [2], [0, 0, 0, 1, 1, 2], [0], [0]>} : vector<4x8x8xf32>, vector<4x8x8xf32>, vector<4x8x8xf32> -> vector<4x8x8xf32>
    "tpu.trace_stop"() : () -> ()
    %138 = vector.shape_cast %137 : vector<4x8x8xf32> to vector<32x8xf32>
    %c2_93 = arith.constant 2 : index
    %c0_94 = arith.constant 0 : index
    %c0_95 = arith.constant 0 : index
    %139 = vector.load %arg10[%c2_93, %c0_94, %c0_95] : memref<4x8x32xf32, #tpu.memory_space<vmem>>, vector<1x8x32xf32>
    %140 = vector.shape_cast %139 : vector<1x8x32xf32> to vector<8x32xf32>
    %cst_96 = arith.constant dense<0.000000e+00> : vector<32x32xf32>
    %141 = tpu.matmul %138, %140, %cst_96 {dimension_numbers = #tpu.dot_dimension_numbers<[1], [0], [0], [1], [0, 0, 1, 1], [], []>} : vector<32x8xf32>, vector<8x32xf32>, vector<32x32xf32> -> vector<32x32xf32>
    %142 = arith.addf %97, %141 : vector<32x32xf32>
    %c3 = arith.constant 3 : index
    %c0_97 = arith.constant 0 : index
    %c0_98 = arith.constant 0 : index
    %143 = vector.load %arg4[%c3, %c0_97, %c0_98] : memref<4x32x8xf32, #tpu.memory_space<vmem>>, vector<1x32x8xf32>
    %144 = vector.shape_cast %143 : vector<1x32x8xf32> to vector<32x8xf32>
    %cst_99 = arith.constant dense<0.000000e+00> : vector<32x8xf32>
    %145 = tpu.matmul %1, %144, %cst_99 {dimension_numbers = #tpu.dot_dimension_numbers<[1], [0], [0], [1], [0, 0, 1, 1], [], []>} : vector<32x32xf32>, vector<32x8xf32>, vector<32x8xf32> -> vector<32x8xf32>
    %c3_100 = arith.constant 3 : index
    %c0_101 = arith.constant 0 : index
    %c0_102 = arith.constant 0 : index
    %146 = vector.load %arg5[%c3_100, %c0_101, %c0_102] : memref<4x1x8xf32, #tpu.memory_space<vmem>>, vector<1x1x8xf32>
    %147 = vector.shape_cast %146 : vector<1x1x8xf32> to vector<1x8xf32>
    %148 = vector.broadcast %147 : vector<1x8xf32> to vector<32x8xf32>
    %149 = arith.addf %145, %148 : vector<32x8xf32>
    %150 = vector.shape_cast %149 : vector<32x8xf32> to vector<4x8x8xf32>
    %c3_103 = arith.constant 3 : index
    %c0_104 = arith.constant 0 : index
    %c0_105 = arith.constant 0 : index
    %151 = vector.load %arg6[%c3_103, %c0_104, %c0_105] : memref<4x32x8xf32, #tpu.memory_space<vmem>>, vector<1x32x8xf32>
    %152 = vector.shape_cast %151 : vector<1x32x8xf32> to vector<32x8xf32>
    %cst_106 = arith.constant dense<0.000000e+00> : vector<32x8xf32>
    %153 = tpu.matmul %3, %152, %cst_106 {dimension_numbers = #tpu.dot_dimension_numbers<[1], [0], [0], [1], [0, 0, 1, 1], [], []>} : vector<32x32xf32>, vector<32x8xf32>, vector<32x8xf32> -> vector<32x8xf32>
    %c3_107 = arith.constant 3 : index
    %c0_108 = arith.constant 0 : index
    %c0_109 = arith.constant 0 : index
    %154 = vector.load %arg7[%c3_107, %c0_108, %c0_109] : memref<4x1x8xf32, #tpu.memory_space<vmem>>, vector<1x1x8xf32>
    %155 = vector.shape_cast %154 : vector<1x1x8xf32> to vector<1x8xf32>
    %156 = vector.broadcast %155 : vector<1x8xf32> to vector<32x8xf32>
    %157 = arith.addf %153, %156 : vector<32x8xf32>
    %158 = vector.shape_cast %157 : vector<32x8xf32> to vector<4x8x8xf32>
    %c3_110 = arith.constant 3 : index
    %c0_111 = arith.constant 0 : index
    %c0_112 = arith.constant 0 : index
    %159 = vector.load %arg8[%c3_110, %c0_111, %c0_112] : memref<4x32x8xf32, #tpu.memory_space<vmem>>, vector<1x32x8xf32>
    %160 = vector.shape_cast %159 : vector<1x32x8xf32> to vector<32x8xf32>
    %cst_113 = arith.constant dense<0.000000e+00> : vector<32x8xf32>
    %161 = tpu.matmul %5, %160, %cst_113 {dimension_numbers = #tpu.dot_dimension_numbers<[1], [0], [0], [1], [0, 0, 1, 1], [], []>} : vector<32x32xf32>, vector<32x8xf32>, vector<32x8xf32> -> vector<32x8xf32>
    %c3_114 = arith.constant 3 : index
    %c0_115 = arith.constant 0 : index
    %c0_116 = arith.constant 0 : index
    %162 = vector.load %arg9[%c3_114, %c0_115, %c0_116] : memref<4x1x8xf32, #tpu.memory_space<vmem>>, vector<1x1x8xf32>
    %163 = vector.shape_cast %162 : vector<1x1x8xf32> to vector<1x8xf32>
    %164 = vector.broadcast %163 : vector<1x8xf32> to vector<32x8xf32>
    %165 = arith.addf %161, %164 : vector<32x8xf32>
    %166 = vector.shape_cast %165 : vector<32x8xf32> to vector<4x8x8xf32>
    "tpu.trace_start"() <{level = 10 : i32, message = "btd,bsd->bts"}> : () -> ()
    %cst_117 = arith.constant dense<0.000000e+00> : vector<4x8x8xf32>
    %167 = tpu.matmul %150, %158, %cst_117 {dimension_numbers = #tpu.dot_dimension_numbers<[2], [2], [1], [1], [0, 0, 0, 1, 1, 1], [0], [0]>} : vector<4x8x8xf32>, vector<4x8x8xf32>, vector<4x8x8xf32> -> vector<4x8x8xf32>
    "tpu.trace_stop"() : () -> ()
    %cst_118 = arith.constant dense<0xFF800000> : vector<4x8xf32>
    %168 = vector.multi_reduction <maximumf>, %167, %cst_118 [2] : vector<4x8x8xf32> to vector<4x8xf32>
    %169 = vector.shape_cast %168 : vector<4x8xf32> to vector<4x8x1xf32>
    %170 = vector.broadcast %169 : vector<4x8x1xf32> to vector<4x8x8xf32>
    %171 = arith.subf %167, %170 : vector<4x8x8xf32>
    %172 = math.exp %171 : vector<4x8x8xf32>
    %cst_119 = arith.constant dense<0.000000e+00> : vector<4x8xf32>
    %173 = vector.multi_reduction <add>, %172, %cst_119 [2] : vector<4x8x8xf32> to vector<4x8xf32>
    %174 = vector.shape_cast %173 : vector<4x8xf32> to vector<4x8x1xf32>
    %175 = tpu.reciprocal %174 {approx = true} : vector<4x8x1xf32> -> vector<4x8x1xf32>
    %176 = arith.mulf %174, %175 : vector<4x8x1xf32>
    %cst_120 = arith.constant 2.000000e+00 : f32
    %177 = vector.broadcast %cst_120 : f32 to vector<4x8x1xf32>
    %178 = arith.subf %177, %176 : vector<4x8x1xf32>
    %179 = arith.mulf %175, %178 : vector<4x8x1xf32>
    %180 = vector.broadcast %179 : vector<4x8x1xf32> to vector<4x8x8xf32>
    %181 = arith.mulf %172, %180 : vector<4x8x8xf32>
    "tpu.trace_start"() <{level = 10 : i32, message = "bts,bsd->btd"}> : () -> ()
    %cst_121 = arith.constant dense<0.000000e+00> : vector<4x8x8xf32>
    %182 = tpu.matmul %181, %166, %cst_121 {dimension_numbers = #tpu.dot_dimension_numbers<[2], [1], [1], [2], [0, 0, 0, 1, 1, 2], [0], [0]>} : vector<4x8x8xf32>, vector<4x8x8xf32>, vector<4x8x8xf32> -> vector<4x8x8xf32>
    "tpu.trace_stop"() : () -> ()
    %183 = vector.shape_cast %182 : vector<4x8x8xf32> to vector<32x8xf32>
    %c3_122 = arith.constant 3 : index
    %c0_123 = arith.constant 0 : index
    %c0_124 = arith.constant 0 : index
    %184 = vector.load %arg10[%c3_122, %c0_123, %c0_124] : memref<4x8x32xf32, #tpu.memory_space<vmem>>, vector<1x8x32xf32>
    %185 = vector.shape_cast %184 : vector<1x8x32xf32> to vector<8x32xf32>
    %cst_125 = arith.constant dense<0.000000e+00> : vector<32x32xf32>
    %186 = tpu.matmul %183, %185, %cst_125 {dimension_numbers = #tpu.dot_dimension_numbers<[1], [0], [0], [1], [0, 0, 1, 1], [], []>} : vector<32x8xf32>, vector<8x32xf32>, vector<32x32xf32> -> vector<32x32xf32>
    %187 = arith.addf %142, %186 : vector<32x32xf32>
    %188 = arith.addf %1, %187 : vector<32x32xf32>
    %c0_126 = arith.constant 0 : index
    %c0_127 = arith.constant 0 : index
    %189 = vector.load %arg12[%c0_126, %c0_127] : memref<1x32xf32, #tpu.memory_space<vmem>>, vector<1x32xf32>
    %c0_128 = arith.constant 0 : index
    %c0_129 = arith.constant 0 : index
    %190 = vector.load %arg13[%c0_128, %c0_129] : memref<1x32xf32, #tpu.memory_space<vmem>>, vector<1x32xf32>
    %cst_130 = arith.constant dense<0.000000e+00> : vector<32xf32>
    %191 = vector.multi_reduction <add>, %188, %cst_130 [1] : vector<32x32xf32> to vector<32xf32>
    %192 = vector.shape_cast %191 : vector<32xf32> to vector<32x1xf32>
    %cst_131 = arith.constant 3.200000e+01 : f32
    %193 = vector.broadcast %cst_131 : f32 to vector<32x1xf32>
    %194 = arith.divf %192, %193 : vector<32x1xf32>
    %195 = arith.mulf %188, %188 : vector<32x32xf32>
    %cst_132 = arith.constant dense<0.000000e+00> : vector<32xf32>
    %196 = vector.multi_reduction <add>, %195, %cst_132 [1] : vector<32x32xf32> to vector<32xf32>
    %197 = vector.shape_cast %196 : vector<32xf32> to vector<32x1xf32>
    %cst_133 = arith.constant 3.200000e+01 : f32
    %198 = vector.broadcast %cst_133 : f32 to vector<32x1xf32>
    %199 = arith.divf %197, %198 : vector<32x1xf32>
    %200 = arith.mulf %194, %194 : vector<32x1xf32>
    %201 = arith.subf %199, %200 : vector<32x1xf32>
    %202 = vector.broadcast %194 : vector<32x1xf32> to vector<32x32xf32>
    %203 = arith.subf %188, %202 : vector<32x32xf32>
    %cst_134 = arith.constant 9.99999974E-6 : f32
    %204 = vector.broadcast %cst_134 : f32 to vector<32x1xf32>
    %205 = arith.addf %201, %204 : vector<32x1xf32>
    %206 = math.rsqrt %205 : vector<32x1xf32>
    %207 = vector.broadcast %206 : vector<32x1xf32> to vector<32x32xf32>
    %208 = arith.mulf %203, %207 : vector<32x32xf32>
    %209 = vector.broadcast %189 : vector<1x32xf32> to vector<32x32xf32>
    %210 = arith.mulf %208, %209 : vector<32x32xf32>
    %211 = vector.broadcast %190 : vector<1x32xf32> to vector<32x32xf32>
    %212 = arith.addf %210, %211 : vector<32x32xf32>
    %c0_135 = arith.constant 0 : index
    %c0_136 = arith.constant 0 : index
    %213 = vector.load %arg14[%c0_135, %c0_136] : memref<32x64xf32, #tpu.memory_space<vmem>>, vector<32x64xf32>
    %cst_137 = arith.constant dense<0.000000e+00> : vector<32x64xf32>
    %214 = tpu.matmul %212, %213, %cst_137 {dimension_numbers = #tpu.dot_dimension_numbers<[1], [0], [0], [1], [0, 0, 1, 1], [], []>} : vector<32x32xf32>, vector<32x64xf32>, vector<32x64xf32> -> vector<32x64xf32>
    %c0_138 = arith.constant 0 : index
    %c0_139 = arith.constant 0 : index
    %215 = vector.load %arg15[%c0_138, %c0_139] : memref<1x64xf32, #tpu.memory_space<vmem>>, vector<1x64xf32>
    %216 = vector.broadcast %215 : vector<1x64xf32> to vector<32x64xf32>
    %217 = arith.addf %214, %216 : vector<32x64xf32>
    %cst_140 = arith.constant 0.000000e+00 : f32
    %218 = vector.broadcast %cst_140 : f32 to vector<32x64xf32>
    %219 = arith.maximumf %217, %218 : vector<32x64xf32>
    %c0_141 = arith.constant 0 : index
    %c0_142 = arith.constant 0 : index
    %220 = vector.load %arg16[%c0_141, %c0_142] : memref<64x32xf32, #tpu.memory_space<vmem>>, vector<64x32xf32>
    %cst_143 = arith.constant dense<0.000000e+00> : vector<32x32xf32>
    %221 = tpu.matmul %219, %220, %cst_143 {dimension_numbers = #tpu.dot_dimension_numbers<[1], [0], [0], [1], [0, 0, 1, 1], [], []>} : vector<32x64xf32>, vector<64x32xf32>, vector<32x32xf32> -> vector<32x32xf32>
    %c0_144 = arith.constant 0 : index
    %c0_145 = arith.constant 0 : index
    %222 = vector.load %arg17[%c0_144, %c0_145] : memref<1x32xf32, #tpu.memory_space<vmem>>, vector<1x32xf32>
    %223 = vector.broadcast %222 : vector<1x32xf32> to vector<32x32xf32>
    %224 = arith.addf %221, %223 : vector<32x32xf32>
    %225 = arith.addf %212, %224 : vector<32x32xf32>
    %c0_146 = arith.constant 0 : index
    %c0_147 = arith.constant 0 : index
    %226 = vector.load %arg18[%c0_146, %c0_147] : memref<1x32xf32, #tpu.memory_space<vmem>>, vector<1x32xf32>
    %c0_148 = arith.constant 0 : index
    %c0_149 = arith.constant 0 : index
    %227 = vector.load %arg19[%c0_148, %c0_149] : memref<1x32xf32, #tpu.memory_space<vmem>>, vector<1x32xf32>
    %cst_150 = arith.constant dense<0.000000e+00> : vector<32xf32>
    %228 = vector.multi_reduction <add>, %225, %cst_150 [1] : vector<32x32xf32> to vector<32xf32>
    %229 = vector.shape_cast %228 : vector<32xf32> to vector<32x1xf32>
    %cst_151 = arith.constant 3.200000e+01 : f32
    %230 = vector.broadcast %cst_151 : f32 to vector<32x1xf32>
    %231 = arith.divf %229, %230 : vector<32x1xf32>
    %232 = arith.mulf %225, %225 : vector<32x32xf32>
    %cst_152 = arith.constant dense<0.000000e+00> : vector<32xf32>
    %233 = vector.multi_reduction <add>, %232, %cst_152 [1] : vector<32x32xf32> to vector<32xf32>
    %234 = vector.shape_cast %233 : vector<32xf32> to vector<32x1xf32>
    %cst_153 = arith.constant 3.200000e+01 : f32
    %235 = vector.broadcast %cst_153 : f32 to vector<32x1xf32>
    %236 = arith.divf %234, %235 : vector<32x1xf32>
    %237 = arith.mulf %231, %231 : vector<32x1xf32>
    %238 = arith.subf %236, %237 : vector<32x1xf32>
    %239 = vector.broadcast %231 : vector<32x1xf32> to vector<32x32xf32>
    %240 = arith.subf %225, %239 : vector<32x32xf32>
    %cst_154 = arith.constant 9.99999974E-6 : f32
    %241 = vector.broadcast %cst_154 : f32 to vector<32x1xf32>
    %242 = arith.addf %238, %241 : vector<32x1xf32>
    %243 = math.rsqrt %242 : vector<32x1xf32>
    %244 = vector.broadcast %243 : vector<32x1xf32> to vector<32x32xf32>
    %245 = arith.mulf %240, %244 : vector<32x32xf32>
    %246 = vector.broadcast %226 : vector<1x32xf32> to vector<32x32xf32>
    %247 = arith.mulf %245, %246 : vector<32x32xf32>
    %248 = vector.broadcast %227 : vector<1x32xf32> to vector<32x32xf32>
    %249 = arith.addf %247, %248 : vector<32x32xf32>
    %250 = vector.shape_cast %249 : vector<32x32xf32> to vector<4x8x32xf32>
    %c0_155 = arith.constant 0 : index
    %c0_156 = arith.constant 0 : index
    %c0_157 = arith.constant 0 : index
    %251 = vector.load %arg20[%c0_155, %c0_156, %c0_157] : memref<4x8x32xf32, #tpu.memory_space<vmem>>, vector<4x8x32xf32>
    tpu.vector_store %arg20[%c0_155, %c0_156, %c0_157], %250 {strides = array<i32>} : memref<4x8x32xf32, #tpu.memory_space<vmem>>, vector<4x8x32xf32>,
    return
  }
  func.func @transform_0(%arg0: i32) -> (i32, i32, i32) {
    %c0_i32 = arith.constant 0 : i32
    %c0_i32_0 = arith.constant 0 : i32
    %c0_i32_1 = arith.constant 0 : i32
    return %arg0, %c0_i32, %c0_i32_0 : i32, i32, i32
  }
  func.func @transform_1(%arg0: i32) -> (i32, i32, i32) {
    %c0_i32 = arith.constant 0 : i32
    %c0_i32_0 = arith.constant 0 : i32
    %c0_i32_1 = arith.constant 0 : i32
    return %arg0, %c0_i32, %c0_i32_0 : i32, i32, i32
  }
  func.func @transform_2(%arg0: i32) -> (i32, i32, i32) {
    %c0_i32 = arith.constant 0 : i32
    %c0_i32_0 = arith.constant 0 : i32
    %c0_i32_1 = arith.constant 0 : i32
    return %arg0, %c0_i32, %c0_i32_0 : i32, i32, i32
  }
  func.func @transform_3(%arg0: i32) -> (i32, i32, i32) {
    %c0_i32 = arith.constant 0 : i32
    %c0_i32_0 = arith.constant 0 : i32
    %c0_i32_1 = arith.constant 0 : i32
    %c0_i32_2 = arith.constant 0 : i32
    return %c0_i32, %c0_i32_0, %c0_i32_1 : i32, i32, i32
  }
  func.func @transform_4(%arg0: i32) -> (i32, i32, i32) {
    %c0_i32 = arith.constant 0 : i32
    %c0_i32_0 = arith.constant 0 : i32
    %c0_i32_1 = arith.constant 0 : i32
    %c0_i32_2 = arith.constant 0 : i32
    return %c0_i32, %c0_i32_0, %c0_i32_1 : i32, i32, i32
  }
  func.func @transform_5(%arg0: i32) -> (i32, i32, i32) {
    %c0_i32 = arith.constant 0 : i32
    %c0_i32_0 = arith.constant 0 : i32
    %c0_i32_1 = arith.constant 0 : i32
    %c0_i32_2 = arith.constant 0 : i32
    return %c0_i32, %c0_i32_0, %c0_i32_1 : i32, i32, i32
  }
  func.func @transform_6(%arg0: i32) -> (i32, i32, i32) {
    %c0_i32 = arith.constant 0 : i32
    %c0_i32_0 = arith.constant 0 : i32
    %c0_i32_1 = arith.constant 0 : i32
    %c0_i32_2 = arith.constant 0 : i32
    return %c0_i32, %c0_i32_0, %c0_i32_1 : i32, i32, i32
  }
  func.func @transform_7(%arg0: i32) -> (i32, i32, i32) {
    %c0_i32 = arith.constant 0 : i32
    %c0_i32_0 = arith.constant 0 : i32
    %c0_i32_1 = arith.constant 0 : i32
    %c0_i32_2 = arith.constant 0 : i32
    return %c0_i32, %c0_i32_0, %c0_i32_1 : i32, i32, i32
  }
  func.func @transform_8(%arg0: i32) -> (i32, i32, i32) {
    %c0_i32 = arith.constant 0 : i32
    %c0_i32_0 = arith.constant 0 : i32
    %c0_i32_1 = arith.constant 0 : i32
    %c0_i32_2 = arith.constant 0 : i32
    return %c0_i32, %c0_i32_0, %c0_i32_1 : i32, i32, i32
  }
  func.func @transform_9(%arg0: i32) -> (i32, i32, i32) {
    %c0_i32 = arith.constant 0 : i32
    %c0_i32_0 = arith.constant 0 : i32
    %c0_i32_1 = arith.constant 0 : i32
    %c0_i32_2 = arith.constant 0 : i32
    return %c0_i32, %c0_i32_0, %c0_i32_1 : i32, i32, i32
  }
  func.func @transform_10(%arg0: i32) -> (i32, i32) {
    %c0_i32 = arith.constant 0 : i32
    %c0_i32_0 = arith.constant 0 : i32
    %c0_i32_1 = arith.constant 0 : i32
    return %c0_i32, %c0_i32_0 : i32, i32
  }
  func.func @transform_11(%arg0: i32) -> (i32, i32) {
    %c0_i32 = arith.constant 0 : i32
    %c0_i32_0 = arith.constant 0 : i32
    %c0_i32_1 = arith.constant 0 : i32
    return %c0_i32, %c0_i32_0 : i32, i32
  }
  func.func @transform_12(%arg0: i32) -> (i32, i32) {
    %c0_i32 = arith.constant 0 : i32
    %c0_i32_0 = arith.constant 0 : i32
    %c0_i32_1 = arith.constant 0 : i32
    return %c0_i32, %c0_i32_0 : i32, i32
  }
  func.func @transform_13(%arg0: i32) -> (i32, i32) {
    %c0_i32 = arith.constant 0 : i32
    %c0_i32_0 = arith.constant 0 : i32
    %c0_i32_1 = arith.constant 0 : i32
    return %c0_i32, %c0_i32_0 : i32, i32
  }
  func.func @transform_14(%arg0: i32) -> (i32, i32) {
    %c0_i32 = arith.constant 0 : i32
    %c0_i32_0 = arith.constant 0 : i32
    %c0_i32_1 = arith.constant 0 : i32
    return %c0_i32, %c0_i32_0 : i32, i32
  }
  func.func @transform_15(%arg0: i32) -> (i32, i32) {
    %c0_i32 = arith.constant 0 : i32
    %c0_i32_0 = arith.constant 0 : i32
    %c0_i32_1 = arith.constant 0 : i32
    return %c0_i32, %c0_i32_0 : i32, i32
  }
  func.func @transform_16(%arg0: i32) -> (i32, i32) {
    %c0_i32 = arith.constant 0 : i32
    %c0_i32_0 = arith.constant 0 : i32
    %c0_i32_1 = arith.constant 0 : i32
    return %c0_i32, %c0_i32_0 : i32, i32
  }
  func.func @transform_17(%arg0: i32) -> (i32, i32) {
    %c0_i32 = arith.constant 0 : i32
    %c0_i32_0 = arith.constant 0 : i32
    %c0_i32_1 = arith.constant 0 : i32
    return %c0_i32, %c0_i32_0 : i32, i32
  }
  func.func @transform_18(%arg0: i32) -> (i32, i32) {
    %c0_i32 = arith.constant 0 : i32
    %c0_i32_0 = arith.constant 0 : i32
    %c0_i32_1 = arith.constant 0 : i32
    return %c0_i32, %c0_i32_0 : i32, i32
  }
  func.func @transform_19(%arg0: i32) -> (i32, i32, i32) {
    %c0_i32 = arith.constant 0 : i32
    %c0_i32_0 = arith.constant 0 : i32
    %c0_i32_1 = arith.constant 0 : i32
    return %arg0, %c0_i32, %c0_i32_0 : i32, i32, i32
  }
}

</mosaic_0001>

<bundles_post_ra>
// kernel: tpu_custom_call.1
= control target key start
LH: loop header
LB: loop body
LE: loop exit
PB: predicated region body
PF: predicated region fallthrough
CT: control target
= control target key end

     0   :  { %s7456_s0 = inlined_call_operand.vmem [shape: f32[8,8,32], index: 0, kind: input, shape index: {}]   ;;  %s7457_s1 = inlined_call_operand.vmem [shape: f32[8,8,32], index: 1, kind: input, shape index: {}]   ;;  %s7458_s2 = inlined_call_operand.vmem [shape: f32[8,8,32], index: 2, kind: input, shape index: {}]   ;;  %s7459_s3 = inlined_call_operand.vmem [shape: f32[4,32,8], index: 3, kind: input, shape index: {}]   ;;  %s7460_s4 = inlined_call_operand.vmem [shape: f32[4,1,8], index: 4, kind: input, shape index: {}]   ;;  %s7461_s5 = inlined_call_operand.vmem [shape: f32[4,32,8], index: 5, kind: input, shape index: {}]   ;;  %s7462_s6 = inlined_call_operand.vmem [shape: f32[4,1,8], index: 6, kind: input, shape index: {}]   ;;  %s7463_s7 = inlined_call_operand.vmem [shape: f32[4,32,8], index: 7, kind: input, shape index: {}]   ;;  %s7464_s8 = inlined_call_operand.vmem [shape: f32[4,1,8], index: 8, kind: input, shape index: {}]   ;;  %s7465_s9 = inlined_call_operand.vmem [shape: f32[4,8,32], index: 9, kind: input, shape index: {}]   ;;  %s7466_s10 = inlined_call_operand.vmem [shape: f32[1,32], index: 10, kind: input, shape index: {}]   ;;  %s7467_s11 = inlined_call_operand.vmem [shape: f32[1,32], index: 11, kind: input, shape index: {}]   ;;  %s7468_s12 = inlined_call_operand.vmem [shape: f32[1,32], index: 12, kind: input, shape index: {}]   ;;  %s7469_s13 = inlined_call_operand.vmem [shape: f32[32,64], index: 13, kind: input, shape index: {}]   ;;  %s7470_s14 = inlined_call_operand.vmem [shape: f32[1,64], index: 14, kind: input, shape index: {}]   ;;  %s7471_s15 = inlined_call_operand.vmem [shape: f32[64,32], index: 15, kind: input, shape index: {}]   ;;  %s7472_s16 = inlined_call_operand.vmem [shape: f32[1,32], index: 16, kind: input, shape index: {}]   ;;  %s7473_s17 = inlined_call_operand.vmem [shape: f32[1,32], index: 17, kind: input, shape index: {}]   ;;  %s7474_s18 = inlined_call_operand.vmem [shape: f32[1,32], index: 18, kind: input, shape index: {}]   ;;  %s7475_s19 = inlined_call_operand.hbm [shape: f32[8,8,32], index: 19, kind: output, shape index: {}]  }
   0x1   :  { %7486 = sst [smem:[#allocation12_spill]] %s7456_s0 }
   0x2   :  { %7487 = sst [smem:[#allocation13_spill]] %s7457_s1 }
   0x3   :  { %7488 = sst [smem:[#allocation14_spill]] %s7458_s2 }
   0x4   :  { %7489 = sst [smem:[#allocation15_spill]] %s7459_s3 }
   0x5   :  { %7490 = sst [smem:[#allocation16_spill]] %s7475_s19 }
   0x6   :  { %24 = vsyncpa [#allocation3], 0 }
   0x7   :  { %26 = vsyncpa [#allocation3 + $0x1], 0  ;;  %s6636_s0 = smov 0   ;;  %s6638_s30 = smov 0  }
   0x8   :  { %s6640_s20 = smov 0   ;;  %s6642_s21 = smov 0  }
   0x9 LB: > { %7491 = sst [smem:[#allocation5_spill]] %s6517_s0  ;;  %s6657_s1 = sadd.s32 4294967295, %s6529_s21   ;;  %s6529_s21 = sphi %s6642_s21, %s7509_s21   ;;  %s6525_s20 = sphi %s6640_s20, %s7511_s20   ;;  %s6521_s30 = sphi %s6638_s30, %s7513_s30   ;;  %s6517_s0 = sphi %s6636_s0, %s7512_s0  }
   0xa   : > { %7492 = sst [smem:[#allocation6_spill]] %s6525_s20  ;;  %s5396_s22 = sadd.s32 4294967294, %s6529_s21  }
   0xb   : > { %7493 = sst [smem:[#allocation7_spill]] %s6529_s21  ;;  %s6661_s2 = sadd.s32 1, %s6529_s21  }
   0xc   : > { %7494 = sst [smem:[#allocation8_spill]] %s6661_s2  ;;  %s453_s23 = sadd.s32 1, %s6525_s20 }
   0xd   : > { %s450_s24 = ssub.s32 %s6529_s21, %s6661_s2  ;;  %p463_p0 = scmp.ne.s32.totalorder %s6525_s20, %s6521_s30 }
   0xe   : > { %p451_p1 = scmp.eq.s32.totalorder %s450_s24, 0  ;;  %p464_p2 = scmp.eq.s32.totalorder %s6657_s1, 1 }
   0xf   : > { %p469_p3 = scmp.ne.s32.totalorder %s6521_s30, %s6517_s0  ;;  %p470_p4 = scmp.eq.s32.totalorder %s5396_s22, 1 }
  0x10   : > { %s6672_s25 = scalar_select %p451_p1, %s6525_s20, %s453_s23  }
  0x11   : > { %p6674_p5 = por %p464_p2, %p463_p0  ;;  %p6678_p6 = por %p470_p4, %p469_p3 }
  0x12   : > { %7495 = sst [smem:[#allocation9_spill]] %s6672_s25  ;;  %p5399_p7 = scmp.ge.s32.totalorder %s6529_s21, 1 }
  0x13   : > { %s7496_s3 = scalar_select %p6674_p5, 1, 0 }
  0x14   : > { %s7498_s26 = scalar_select %p6678_p6, 1, 0 }
  0x15   : > { %7497 = sst [smem:[#allocation10_spill]] %s7496_s3  ;;  %p563_p8 = scmp.lt.s32.totalorder %s6529_s21, 3 }
  0x16   : > { %7499 = sst [smem:[#allocation11_spill]] %s7498_s26 }
  0x17   : > { %p564_p9 = pnand %p5399_p7, %p563_p8 }
  0x18   : > { %s7500_s29 = sld [smem:[#allocation15_spill]] (!%p564_p9)  ;;  %s5401_s20 = sshll.u32 (!%p564_p9), %s6657_s1, 2  ;;  %v770_v6 = vld [vmem:[%s7461_s5] sm:$0xff] (!%p564_p9)  ;;  %v771_v7 = vld [vmem:[%s7461_s5 + $0x8] sm:$0xff] (!%p564_p9)  ;;  %vm672_vm0 = vcmask (!%p564_p9), 261120   ;;  %v772_v9 = vld [vmem:[%s7461_s5 + $0x10] sm:$0xff] (!%p564_p9) }
  0x19   : > { %567 = sbr.rel (%p564_p9) target bundleno = 4953 (0x1359), region = 96  ;;  %p630_p10 = scmp.lt.s32.totalorder (!%p564_p9), %s5401_s20, 7  ;;  %v6204_v8 = vpack.c.bf16 (!%p564_p9), %v771_v7, %v770_v6  ;;  %v773_v10 = vld [vmem:[%s7461_s5 + $0x18] sm:$0xff] (!%p564_p9)  ;;  %v878_v20 = vld [vmem:[%s7463_s7] sm:$0xff] (!%p564_p9)  ;;  %v879_v21 = vld [vmem:[%s7463_s7 + $0x8] sm:$0xff] (!%p564_p9)  ;;  %v6531_v28 = vmov (!%p564_p9), 0.0  }
  0x1a   : > { %s7501_s22 = sld [smem:[#allocation12_spill]] (!%p564_p9)  ;;  %v6208_v14 = vpack.c.bf16 (!%p564_p9), %v773_v10, %v772_v9  ;;  %s7502_s2 = sld [smem:[#allocation13_spill]] (!%p564_p9)  ;;  %v6212_v22 = vpack.c.bf16 (!%p564_p9), %v879_v21, %v878_v20  ;;  %v880_v23 = vld [vmem:[%s7463_s7 + $0x10] sm:$0xff] (!%p564_p9)  ;;  %v881_v24 = vld [vmem:[%s7463_s7 + $0x18] sm:$0xff] (!%p564_p9)  ;;  %vm6532_vm1 = vmmov (!%p564_p9), 0   ;;  %vm986_vm2 = vcmask (!%p564_p9), 64512  }
  0x1b   : > { %v6216_v25 = vpack.c.bf16 (!%p564_p9), %v881_v24, %v880_v23  ;;  %s7503_s19 = sld [smem:[#allocation14_spill]] (!%p564_p9)  ;;  %v5412_v35 = vld [vmem:[%s7462_s6] ss:$0 sm:$0xff] (!%p564_p9)  ;;  %vm5108_vm3 = vcmask (!%p564_p9), 523264   ;;  %s5599_s21 = sshll.u32 (!%p564_p9), %s6657_s1, 9 }
  0x1c   : > { %6213 = vmatprep.subr.bf16.mxu0 (!%p564_p9), %v6212_v22  ;;  %v5407_v38 = vld [vmem:[%s7460_s4] ss:$0 sm:$0xff] (!%p564_p9)  ;;  %s7505_s28 = sld [smem:[#allocation16_spill]] (!%p564_p9) }
  0x1d   : > { %6215 = vmatpush3.bf16.msra.mxu0 (!%p564_p9), %v6212_v22  ;;  %v5417_v49 = vld [vmem:[%s7464_s8] ss:$0 sm:$0xff] (!%p564_p9) }
  0x1e   : > { %v661_v0 = vld [vmem:[%s7500_s29] sm:$0xff] (!%p564_p9)  ;;  %v662_v1 = vld [vmem:[%s7500_s29 + $0x8] sm:$0xff] (!%p564_p9)  ;;  %v663_v2 = vld [vmem:[%s7500_s29 + $0x10] sm:$0xff] (!%p564_p9)  ;;  %6217 = vmatprep.subr.bf16.mxu0 (!%p564_p9), %v6216_v25 }
  0x1f   : > { %v6196_v3 = vpack.c.bf16 (!%p564_p9), %v662_v1, %v661_v0  ;;  %v664_v4 = vld [vmem:[%s7500_s29 + $0x18] sm:$0xff] (!%p564_p9) }
  0x20   : > { %v6200_v5 = vpack.c.bf16 %v664_v4, %v663_v2  ;;  %s7515_s20 = smov (!%p630_p10, %s5401_s20), 7 }
  0x21   : > { %6197 = vmatprep.subr.bf16.mxu1 %v6196_v3  ;;  %s6703_s25 = sshll.u32 %s7515_s20, 3  ;;  %6219 = vmatpush3.bf16.msra.mxu0 %v6216_v25 }
  0x22   : > { %6199 = vmatpush3.bf16.msra.mxu1 %v6196_v3  ;;  %s6709_s23 = scalar_lea.vmem %s7501_s22, %s6703_s25  ;;  %s6732_s26 = scalar_lea.vmem %s7502_s2, %s6703_s25  ;;  %5852 = vmatprep.subr.mxu0 %v6531_v28 }
  0x23   : > { %6201 = vmatprep.subr.bf16.mxu1 %v6200_v5  ;;  %v6718_v11 = vld [vmem:[%s6709_s23] sm:$0xff]  ;;  %v6723_v12 = vld [vmem:[%s6709_s23 + $0x8] sm:$0xff]  ;;  %v6726_v13 = vld [vmem:[%s6709_s23 + $0x10] sm:$0xff]  ;;  %s6779_s3 = scalar_lea.vmem %s7503_s19, %s6703_s25  ;;  %s626_s2 = sand.u32 1, %s6521_s30  }
  0x24   : > { %5808 = vmatprep.mubr.msk.f32.mxu1 %vm672_vm0, %v6718_v11  ;;  %v6739_v15 = vld [vmem:[%s6709_s23 + $0x18] sm:$0xff]  ;;  %v6742_v16 = vld [vmem:[%s6732_s26] sm:$0xff]  ;;  %v6749_v17 = vld [vmem:[%s6732_s26 + $0x8] sm:$0xff]  ;;  %s5400_s0 = sshll.u32 %s626_s2, 5  ;;  %s7415_s1 = scalar_lea.sflag [#allocation3], %s626_s2 }
  0x25   : > { %v6752_v18 = vld [vmem:[%s6732_s26 + $0x10] sm:$0xff]  ;;  %v6759_v19 = vld [vmem:[%s6732_s26 + $0x18] sm:$0xff]  ;;  %v6782_v26 = vld [vmem:[%s6779_s3] sm:$0xff] }
  0x26   : > { %6203 = vmatpush3.bf16.msra.mxu1 %v6200_v5  ;;  %5836 = vmatprep.mubr.msk.f32.mxu0 %vm672_vm0, %v6782_v26  ;;  %v6787_v27 = vld [vmem:[%s6779_s3 + $0x8] sm:$0xff]  ;;  %v6794_v29 = vld [vmem:[%s6779_s3 + $0x10] sm:$0xff]  ;;  %v6799_v30 = vld [vmem:[%s6779_s3 + $0x18] sm:$0xff] }
  0x27   : > { %6205 = vmatprep.subr.bf16.mxu1 %v6204_v8  ;;  %5837 = vmatmul.mubr.msk.f32.vlgmr.msra.gmra.mrb[0].mxu0 %vm672_vm0, %v6787_v27 }
  0x28   : > { %5839 = vmatprep.mubr.msk.f32.mxu0 %vm672_vm0, %v6794_v29 }
  0x29   : > { %5809 = vmatmul.mubr.msk.f32.vlgmr.msra.gmra.mrb[0].mxu1 %vm672_vm0, %v6723_v12 }
  0x2a   : > { %6207 = vmatpush3.bf16.msra.mxu1 %v6204_v8  ;;  %5811 = vmatprep.mubr.msk.f32.mxu1 %vm672_vm0, %v6726_v13 }
  0x2b   : > { %6209 = vmatprep.subr.bf16.mxu1 %v6208_v14  ;;  %5840 = vmatmul.mubr.msk.f32.gmra.mrb[2].mxu0 %vm672_vm0, %v6799_v30 }
  0x2c   : > { %5854 = vmatprep.mubr.msk.f32.mxu0 %vm6532_vm1, %v6531_v28 }
  0x2d   : > { %5812 = vmatmul.mubr.msk.f32.gmra.mrb[2].mxu1 %vm672_vm0, %v6739_v15 }
  0x2e   : > { %6211 = vmatpush3.bf16.msra.mxu1 %v6208_v14  ;;  %5822 = vmatprep.mubr.msk.f32.mxu1 %vm672_vm0, %v6742_v16 }
  0x2f   : > { %5842 = vmatprep.subr.mxu1 %v6531_v28 }
  0x31   : > { %5823 = vmatmul.mubr.msk.f32.vlgmr.msra.gmra.mrb[4].mxu1 %vm672_vm0, %v6749_v17 }
  0x32   : > { %5825 = vmatprep.mubr.msk.f32.mxu1 %vm672_vm0, %v6752_v18 }
  0x35   : > { %5826 = vmatmul.mubr.msk.f32.gmra.mrb[6].mxu1 %vm672_vm0, %v6759_v19 }
  0x36   : > { %5844 = vmatprep.mubr.msk.f32.mxu1 %vm6532_vm1, %v6531_v28 }
  0xfa   : > { %v5838_v50 = vpop.f32.mrb[0].mxu0 }
  0xfb   : > { %v973_v51 = vadd.f32 %v5838_v50, %v5417_v49  ;;  %v967_v52 = vpop.f32.mrb[1].mxu0 }
  0xfc   : > { %v5810_v31 = vpop.f32.mrb[0].mxu1  ;;  %v968_v53 = vadd.f32 %v5417_v49, %v967_v52 }
  0xfd   : > { %v751_v32 = vpop.f32.mrb[1].mxu1  ;;  %v757_v45 = vadd.f32 %v5810_v31, %v5407_v38 }
  0xfe   : > { %v752_v41 = vadd.f32 %v5407_v38, %v751_v32  ;;  %v5841_v54 = vpop.f32.mrb[2].mxu0 }
  0xff   : > { %v6837_v55 = vadd.f32 %v5841_v54, %v5417_v49  ;;  %v977_v56 = vpop.f32.mrb[3].mxu0 }
 0x100   : > { %v5813_v33 = vpop.f32.mrb[2].mxu1  ;;  %v6840_v57 = vadd.f32 %v5417_v49, %v977_v56 }
 0x101   : > { %v761_v34 = vpop.f32.mrb[3].mxu1  ;;  %v767_v48 = vadd.f32 %v5813_v33, %v5407_v38 }
 0x102   : > { %v762_v46 = vadd.f32 %v5407_v38, %v761_v34 }
 0x104   : > { %v5824_v36 = vpop.f32.mrb[4].mxu1 }
 0x105   : > { %v859_v37 = vpop.f32.mrb[5].mxu1  ;;  %v865_v43 = vadd.f32 %v5824_v36, %v5412_v35 }
 0x106   : > { %v860_v39 = vadd.f32 %v5412_v35, %v859_v37 }
 0x108   : > { %v5827_v40 = vpop.f32.mrb[6].mxu1  ;;  %5843 = vmatpush3.xpose.msk.msra.mxu1 %vm986_vm2, %v860_v39 }
 0x109   : > { %v869_v42 = vpop.f32.mrb[7].mxu1  ;;  %5847 = vmatprep.subr.mxu1 %v6531_v28  ;;  %v875_v47 = vadd.f32 %v5827_v40, %v5412_v35 }
 0x10a   : > { %v870_v44 = vadd.f32 %v5412_v35, %v869_v42 }
 0x10b   : > { %5845 = vmatmul.mubr.msk.f32.vlgmr.msra.gmra.mrb[8].mxu1 %vm986_vm2, %v752_v41 }
 0x10c   : > { %5848 = vmatpush3.xpose.msk.msra.mxu1 %vm986_vm2, %v865_v43  ;;  %5853 = vmatpush3.xpose.msk.msra.mxu0 %vm986_vm2, %v870_v44 }
 0x10d   : > { %5849 = vmatprep.mubr.msk.f32.mxu1 %vm6532_vm1, %v6531_v28  ;;  %5857 = vmatprep.subr.mxu1 %v6531_v28 }
 0x10e   : > { %5862 = vmatprep.subr.mxu0 %v6531_v28 }
 0x10f   : > { %5850 = vmatmul.mubr.msk.f32.vlgmr.msra.gmra.mrb[10].mxu1 %vm986_vm2, %v757_v45  ;;  %5855 = vmatmul.mubr.msk.f32.vlgmr.msra.gmra.mrb[4].mxu0 %vm986_vm2, %v762_v46 }
 0x110   : > { %5858 = vmatpush3.xpose.msk.msra.mxu1 %vm986_vm2, %v875_v47  ;;  %5859 = vmatprep.mubr.msk.f32.mxu1 %vm6532_vm1, %v6531_v28 }
 0x111   : > { %5867 = vmatprep.subr.mxu1 %v6531_v28  ;;  %5864 = vmatprep.mubr.msk.f32.mxu0 %vm6532_vm1, %v6531_v28 }
 0x112   : > { %5863 = vmatpush3.msra.mxu0 %v968_v53 }
 0x113   : > { %5860 = vmatmul.mubr.msk.f32.vlgmr.msra.gmra.mrb[12].mxu1 %vm986_vm2, %v767_v48  ;;  %5872 = vmatprep.subr.mxu0 %v6531_v28 }
 0x114   : > { %5869 = vmatprep.mubr.msk.f32.mxu1 %vm6532_vm1, %v6531_v28  ;;  %5868 = vmatpush3.msra.mxu1 %v973_v51 }
 0x115   : > { %5877 = vmatprep.subr.mxu1 %v6531_v28 }
 0x1de   : > { %v1059_v58 = vpop.f32.mrb[8].mxu1 }
 0x1df   : > { %v5846_v59 = vpop.f32.mrb[9].mxu1  ;;  %v1291_v60 = vsel %vm986_vm2, %v1059_v58, -inf }
 0x1e0   : > { %1292 = vmax.xlane.f32.xlu0 %v1291_v60 }
 0x1e2   : > { %v1135_v61 = vpop.f32.mrb[10].mxu1  ;;  %v1211_v62 = vpop.f32.mrb[4].mxu0 }
 0x1e3   : > { %v5851_v63 = vpop.f32.mrb[11].mxu1  ;;  %v5856_v0 = vpop.f32.mrb[5].mxu0  ;;  %v1297_v1 = vsel %vm986_vm2, %v1211_v62, -inf  ;;  %v1294_v2 = vsel %vm986_vm2, %v1135_v61, -inf }
 0x1e4   : > { %1298 = vmax.xlane.f32.xlu1 %v1297_v1  ;;  %1295 = vmax.xlane.f32.xlu0 %v1294_v2  ;;  %v5449_v1 = vld [vmem:[%s7461_s5 + $0x20] sm:$0xff] }
 0x1e6   : > { %v1287_v3 = vpop.f32.mrb[12].mxu1 }
 0x1e7   : > { %v5861_v4 = vpop.f32.mrb[13].mxu1  ;;  %v1300_v5 = vsel %vm986_vm2, %v1287_v3, -inf }
 0x1e8   : > { %1301 = vmax.xlane.f32.xlu1 %v1300_v5  ;;  %v5440_v4 = vld [vmem:[%s7500_s29 + $0x28] sm:$0xff] }
 0x26d   : > { %v1293_v6 = vpop.xlane.xlu0 %1292 }
 0x26e   : > { %v1303_v7 = vsub.f32 %v1059_v58, %v1293_v6  ;;  %v5441_v6 = vld [vmem:[%s7500_s29 + $0x30] sm:$0xff] }
 0x270   : > { %v1307_v8 = vmul.f32 1.442695, %v1303_v7  ;;  %v5442_v7 = vld [vmem:[%s7500_s29 + $0x38] sm:$0xff] }
 0x271   : > { %v1299_v9 = vpop.xlane.xlu1 %1298  ;;  %v1296_v10 = vpop.xlane.xlu0 %1295 }
 0x272   : > { %6375 = vpow2.f32 %v1307_v8  ;;  %v1305_v14 = vsub.f32 %v1211_v62, %v1299_v9  ;;  %v1304_v20 = vsub.f32 %v1135_v61, %v1296_v10  ;;  %v6224_v8 = vpack.c.bf16 %v5442_v7, %v5441_v6  ;;  %v5459_v9 = vld [vmem:[%s7463_s7 + $0x20] sm:$0xff]  ;;  %v5460_v10 = vld [vmem:[%s7463_s7 + $0x28] sm:$0xff] }
 0x274   : > { %v1311_v21 = vmul.f32 1.442695, %v1305_v14  ;;  %v1309_v22 = vmul.f32 1.442695, %v1304_v20  ;;  %v5461_v14 = vld [vmem:[%s7463_s7 + $0x30] sm:$0xff]  ;;  %v6236_v20 = vpack.c.bf16 %v5460_v10, %v5459_v9 }
 0x275   : > { %v1302_v23 = vpop.xlane.xlu1 %1301 }
 0x276   : > { %6377 = vpow2.f32 %v1311_v21  ;;  %v1306_v24 = vsub.f32 %v1287_v3, %v1302_v23  ;;  %v5439_v3 = vld [vmem:[%s7500_s29 + $0x20] sm:$0xff]  ;;  %v5462_v21 = vld [vmem:[%s7463_s7 + $0x38] sm:$0xff] }
 0x277   : > { %6379 = vpow2.f32 %v1309_v22  ;;  %v6220_v5 = vpack.c.bf16 %v5440_v4, %v5439_v3  ;;  %v6240_v22 = vpack.c.bf16 %v5462_v21, %v5461_v14 }
 0x278   : > { %v1313_v25 = vmul.f32 1.442695, %v1306_v24 }
 0x27a   : > { %6381 = vpow2.f32 %v1313_v25  ;;  %v5451_v25 = vld [vmem:[%s7461_s5 + $0x30] sm:$0xff] }
 0x27c   : > { %v6376_v31 = vpop.eup %6375 }
 0x27d   : > { %v1315_v32 = vsel %vm986_vm2, %v6376_v31, 0.0 }
 0x27e   : > { %1316 = vadd.xlane.f32.xlu0 %v1315_v32 }
 0x280   : > { %v6378_v33 = vpop.eup %6377 }
 0x281   : > { %v6380_v34 = vpop.eup %6379  ;;  %v1321_v35 = vsel %vm986_vm2, %v6378_v33, 0.0 }
 0x282   : > { %1322 = vadd.xlane.f32.xlu0 %v1321_v35  ;;  %v1318_v36 = vsel %vm986_vm2, %v6380_v34, 0.0 }
 0x283   : > { %1319 = vadd.xlane.f32.xlu1 %v1318_v36 }
 0x284   : > { %v6382_v37 = vpop.eup %6381 }
 0x285   : > { %v1324_v38 = vsel %vm986_vm2, %v6382_v37, 0.0 }
 0x287   : > { %1325 = vadd.xlane.f32.xlu1 %v1324_v38 }
 0x30b   : > { %v1317_v39 = vpop.xlane.xlu0 %1316 }
 0x30c   : > { %6383 = vrcp.f32 %v1317_v39 }
 0x30f   : > { %v1323_v40 = vpop.xlane.xlu0 %1322 }
 0x310   : > { %6385 = vrcp.f32 %v1323_v40  ;;  %v1320_v41 = vpop.xlane.xlu1 %1319 }
 0x311   : > { %6387 = vrcp.f32 %v1320_v41 }
 0x314   : > { %v1326_v42 = vpop.xlane.xlu1 %1325 }
 0x315   : > { %6389 = vrcp.f32 %v1326_v42 }
 0x316   : > { %v6384_v43 = vpop.eup %6383 }
 0x317   : > { %v1331_v44 = vmul.f32 %v6384_v43, %v1317_v39 }
 0x319   : > { %v1335_v45 = vsub.f32 2.0, %v1331_v44 }
 0x31a   : > { %v6386_v46 = vpop.eup %6385 }
 0x31b   : > { %v6388_v47 = vpop.eup %6387  ;;  %v1339_v48 = vmul.f32 %v6384_v43, %v1335_v45  ;;  %v1333_v49 = vmul.f32 %v6386_v46, %v1323_v40  ;;  %v5454_v45 = vld [vmem:[%s7462_s6 + $0x1] ss:$0 sm:$0xff] }
 0x31c   : > { %v1332_v50 = vmul.f32 %v6388_v47, %v1320_v41 }
 0x31d   : > { %v1343_v51 = vmul.f32 %v6376_v31, %v1339_v48  ;;  %v1337_v52 = vsub.f32 2.0, %v1333_v49  ;;  %v5452_v31 = vld [vmem:[%s7461_s5 + $0x38] sm:$0xff] }
 0x31e   : > { %v1336_v53 = vsub.f32 2.0, %v1332_v50 }
 0x31f   : > { %v6390_v54 = vpop.eup %6389  ;;  %v1341_v56 = vmul.f32 %v6386_v46, %v1337_v52  ;;  %5865 = vmatmul.mubr.msk.f32.vlgmr.msra.gmra.mrb[6].mxu0 %vm986_vm2, %v1343_v51 }
 0x320   : > { %v1340_v58 = vmul.f32 %v6388_v47, %v1336_v53  ;;  %v1334_v59 = vmul.f32 %v6390_v54, %v1326_v42  ;;  %5873 = vmatpush3.msra.mxu0 %v6840_v57  ;;  %5874 = vmatprep.mubr.msk.f32.mxu0 %vm6532_vm1, %v6531_v28  ;;  %v1639_v57 = vld [vmem:[%s7465_s9] sm:$0xff] }
 0x321   : > { %v1345_v60 = vmul.f32 %v6378_v33, %v1341_v56  ;;  %5882 = vmatprep.subr.mxu0 %v1639_v57  ;;  %v6232_v33 = vpack.c.bf16 %v5452_v31, %v5451_v25  ;;  %v5444_v47 = vld [vmem:[%s7460_s4 + $0x1] ss:$0 sm:$0xff] }
 0x322   : > { %v1344_v61 = vmul.f32 %v6380_v34, %v1340_v58  ;;  %v1338_v62 = vsub.f32 2.0, %v1334_v59  ;;  %v6944_v56 = vld [vmem:[%s7464_s8 + $0x1] ss:$0 sm:$0xff] }
 0x323   : > { %5875 = vmatmul.mubr.msk.f32.vlgmr.msra.gmra.mrb[8].mxu0 %vm986_vm2, %v1345_v60 }
 0x324   : > { %v1342_v63 = vmul.f32 %v6390_v54, %v1338_v62  ;;  %5870 = vmatmul.mubr.msk.f32.vlgmr.msra.gmra.mrb[14].mxu1 %vm986_vm2, %v1344_v61  ;;  %5883 = vmatpush3.msra.mxu0 %v1639_v57 }
 0x325   : > { %5878 = vmatpush3.msra.mxu1 %v6837_v55  ;;  %5879 = vmatprep.mubr.msk.f32.mxu1 %vm6532_vm1, %v6531_v28  ;;  %v5450_v55 = vld [vmem:[%s7461_s5 + $0x28] sm:$0xff] }
 0x326   : > { %v1346_v0 = vmul.f32 %v6382_v37, %v1342_v63  ;;  %v6228_v2 = vpack.c.bf16 %v5450_v55, %v5449_v1  ;;  %6221 = vmatprep.subr.bf16.mxu1 %v6220_v5 }
 0x328   : > { %5880 = vmatmul.mubr.msk.f32.vlgmr.msra.gmra.mrb[16].mxu1 %vm986_vm2, %v1346_v0  ;;  %6229 = vmatprep.subr.bf16.mxu0 %v6228_v2 }
 0x329   : > { %5898 = vmatprep.mubr.msk.f32.mxu1 %vm672_vm0, %v6718_v11  ;;  %6223 = vmatpush3.bf16.msra.mxu1 %v6220_v5 }
 0x32a   : > { %6225 = vmatprep.subr.bf16.mxu1 %v6224_v8 }
 0x32d   : > { %6227 = vmatpush3.bf16.msra.mxu1 %v6224_v8 }
 0x32e   : > { %6237 = vmatprep.subr.bf16.mxu1 %v6236_v20 }
 0x330   : > { %5899 = vmatmul.mubr.msk.f32.vlgmr.msra.gmra.mrb[18].mxu1 %vm672_vm0, %v6723_v12 }
 0x331   : > { %5901 = vmatprep.mubr.msk.f32.mxu1 %vm672_vm0, %v6726_v13  ;;  %6239 = vmatpush3.bf16.msra.mxu1 %v6236_v20 }
 0x332   : > { %6241 = vmatprep.subr.bf16.mxu1 %v6240_v22 }
 0x334   : > { %5902 = vmatmul.mubr.msk.f32.gmra.mrb[20].mxu1 %vm672_vm0, %v6739_v15 }
 0x335   : > { %5926 = vmatprep.mubr.msk.f32.mxu1 %vm672_vm0, %v6782_v26  ;;  %6243 = vmatpush3.bf16.msra.mxu1 %v6240_v22 }
 0x336   : > { %5942 = vmatprep.subr.mxu1 %v6531_v28 }
 0x338   : > { %5927 = vmatmul.mubr.msk.f32.vlgmr.msra.gmra.mrb[22].mxu1 %vm672_vm0, %v6787_v27 }
 0x339   : > { %5929 = vmatprep.mubr.msk.f32.mxu1 %vm672_vm0, %v6794_v29 }
 0x33c   : > { %5930 = vmatmul.mubr.msk.f32.gmra.mrb[24].mxu1 %vm672_vm0, %v6799_v30 }
 0x33d   : > { %5944 = vmatprep.mubr.msk.f32.mxu1 %vm6532_vm1, %v6531_v28 }
 0x3f2   : > { %v1416_v23 = vpop.f32.mrb[6].mxu0 }
 0x3f3   : > { %v5866_v24 = vpop.f32.mrb[7].mxu0  ;;  %5884 = vmatprep.mubr.msk.f32.mxu0 %vm986_vm2, %v1416_v23 }
 0x3f6   : > { %v1562_v32 = vpop.f32.mrb[8].mxu0 }
 0x3f7   : > { %v1489_v34 = vpop.f32.mrb[14].mxu1  ;;  %v5876_v35 = vpop.f32.mrb[9].mxu0 }
 0x3f8   : > { %v5871_v36 = vpop.f32.mrb[15].mxu1  ;;  %5885 = vmatmul.mubr.msk.f32.vlgmr.msra.gmra.mrb[10].mxu0 %vm986_vm2, %v1489_v34 }
 0x3f9   : > { %5887 = vmatprep.mubr.msk.f32.mxu0 %vm986_vm2, %v1562_v32  ;;  %6231 = vmatpush3.bf16.msra.mxu0 %v6228_v2 }
 0x3fa   : > { %6233 = vmatprep.subr.bf16.mxu0 %v6232_v33 }
 0x3fb   : > { %v1635_v37 = vpop.f32.mrb[16].mxu1 }
 0x3fc   : > { %v5881_v38 = vpop.f32.mrb[17].mxu1  ;;  %5888 = vmatmul.mubr.msk.f32.gmra.mrb[12].mxu0 %vm986_vm2, %v1635_v37 }
 0x3fd   : > { %6235 = vmatpush3.bf16.msra.mxu0 %v6232_v33  ;;  %5912 = vmatprep.mubr.msk.f32.mxu0 %vm672_vm0, %v6742_v16 }
 0x3fe   : > { %5932 = vmatprep.subr.mxu0 %v6531_v28 }
 0x400   : > { %5913 = vmatmul.mubr.msk.f32.vlgmr.msra.gmra.mrb[14].mxu0 %vm672_vm0, %v6749_v17 }
 0x401   : > { %5915 = vmatprep.mubr.msk.f32.mxu0 %vm672_vm0, %v6752_v18 }
 0x403   : > { %v5900_v39 = vpop.f32.mrb[18].mxu1 }
 0x404   : > { %5916 = vmatmul.mubr.msk.f32.gmra.mrb[16].mxu0 %vm672_vm0, %v6759_v19  ;;  %v1826_v40 = vpop.f32.mrb[19].mxu1  ;;  %v1832_v59 = vadd.f32 %v5900_v39, %v5444_v47 }
 0x405   : > { %5934 = vmatprep.mubr.msk.f32.mxu0 %vm6532_vm1, %v6531_v28  ;;  %v1827_v50 = vadd.f32 %v5444_v47, %v1826_v40 }
 0x407   : > { %v5903_v41 = vpop.f32.mrb[20].mxu1 }
 0x408   : > { %v1836_v42 = vpop.f32.mrb[21].mxu1  ;;  %v1842_v63 = vadd.f32 %v5903_v41, %v5444_v47 }
 0x409   : > { %v1837_v58 = vadd.f32 %v5444_v47, %v1836_v42 }
 0x40b   : > { %v5928_v43 = vpop.f32.mrb[22].mxu1 }
 0x40c   : > { %v2022_v44 = vpop.f32.mrb[23].mxu1  ;;  %v2028_v62 = vadd.f32 %v5928_v43, %v6944_v56 }
 0x40d   : > { %v2023_v60 = vadd.f32 %v6944_v56, %v2022_v44 }
 0x40f   : > { %v6968_v0 = vpop.f32.mrb[24].mxu1 }
 0x410   : > { %v6970_v57 = vpop.f32.mrb[25].mxu1 }
 0x4d3   : > { %v5914_v46 = vpop.f32.mrb[14].mxu0 }
 0x4d4   : > { %v1924_v48 = vpop.f32.mrb[15].mxu0  ;;  %v1930_v53 = vadd.f32 %v5914_v46, %v5454_v45 }
 0x4d5   : > { %v1925_v49 = vadd.f32 %v5454_v45, %v1924_v48 }
 0x4d7   : > { %v5917_v51 = vpop.f32.mrb[16].mxu0  ;;  %5933 = vmatpush3.xpose.msk.msra.mxu0 %vm986_vm2, %v1925_v49 }
 0x4d8   : > { %v1934_v52 = vpop.f32.mrb[17].mxu0  ;;  %5937 = vmatprep.subr.mxu0 %v6531_v28  ;;  %v1940_v61 = vadd.f32 %v5917_v51, %v5454_v45 }
 0x4d9   : > { %v1935_v54 = vadd.f32 %v5454_v45, %v1934_v52 }
 0x4da   : > { %5935 = vmatmul.mubr.msk.f32.vlgmr.msra.gmra.mrb[18].mxu0 %vm986_vm2, %v1827_v50 }
 0x4db   : > { %5938 = vmatpush3.xpose.msk.msra.mxu0 %vm986_vm2, %v1930_v53  ;;  %5943 = vmatpush3.xpose.msk.msra.mxu1 %vm986_vm2, %v1935_v54 }
 0x4dc   : > { %5939 = vmatprep.mubr.msk.f32.mxu0 %vm6532_vm1, %v6531_v28  ;;  %5947 = vmatprep.subr.mxu0 %v6531_v28 }
 0x4dd   : > { %5952 = vmatprep.subr.mxu1 %v6531_v28 }
 0x4de   : > { %5940 = vmatmul.mubr.msk.f32.vlgmr.msra.gmra.mrb[20].mxu0 %vm986_vm2, %v1832_v59  ;;  %5945 = vmatmul.mubr.msk.f32.vlgmr.msra.gmra.mrb[26].mxu1 %vm986_vm2, %v1837_v58 }
 0x4df   : > { %5948 = vmatpush3.xpose.msk.msra.mxu0 %vm986_vm2, %v1940_v61  ;;  %5949 = vmatprep.mubr.msk.f32.mxu0 %vm6532_vm1, %v6531_v28 }
 0x4e0   : > { %5957 = vmatprep.subr.mxu0 %v6531_v28  ;;  %5953 = vmatpush3.msra.mxu1 %v2023_v60 }
 0x4e1   : > { %5954 = vmatprep.mubr.msk.f32.mxu1 %vm6532_vm1, %v6531_v28  ;;  %5962 = vmatprep.subr.mxu1 %v6531_v28 }
 0x4e2   : > { %5950 = vmatmul.mubr.msk.f32.vlgmr.msra.gmra.mrb[22].mxu0 %vm986_vm2, %v1842_v63 }
 0x4e3   : > { %5958 = vmatpush3.msra.mxu0 %v2028_v62  ;;  %5959 = vmatprep.mubr.msk.f32.mxu0 %vm6532_vm1, %v6531_v28  ;;  %v2033_v62 = vadd.f32 %v6944_v56, %v6970_v57 }
 0x4e4   : > { %5967 = vmatprep.subr.mxu0 %v6531_v28 }
 0x5ad   : > { %v2113_v1 = vpop.f32.mrb[18].mxu0 }
 0x5ae   : > { %v5936_v55 = vpop.f32.mrb[19].mxu0  ;;  %v2345_v2 = vsel %vm986_vm2, %v2113_v1, -inf }
 0x5af   : > { %2346 = vmax.xlane.f32.xlu0 %v2345_v2 }
 0x5b1   : > { %v2189_v3 = vpop.f32.mrb[20].mxu0  ;;  %v2265_v4 = vpop.f32.mrb[26].mxu1 }
 0x5b2   : > { %v5941_v5 = vpop.f32.mrb[21].mxu0  ;;  %v5946_v6 = vpop.f32.mrb[27].mxu1  ;;  %v2351_v7 = vsel %vm986_vm2, %v2265_v4, -inf  ;;  %v2348_v8 = vsel %vm986_vm2, %v2189_v3, -inf }
 0x5b3   : > { %2352 = vmax.xlane.f32.xlu0 %v2351_v7  ;;  %2349 = vmax.xlane.f32.xlu1 %v2348_v8  ;;  %v2038_v7 = vadd.f32 %v6968_v0, %v6944_v56  ;;  %v5496_v56 = vld [vmem:[%s7461_s5 + $0x40] sm:$0xff] }
 0x5b5   : > { %v2341_v9 = vpop.f32.mrb[22].mxu0 }
 0x5b6   : > { %v5951_v10 = vpop.f32.mrb[23].mxu0  ;;  %v2354_v14 = vsel %vm986_vm2, %v2341_v9, -inf }
 0x5b7   : > { %2355 = vmax.xlane.f32.xlu1 %v2354_v14  ;;  %v5486_v10 = vld [vmem:[%s7500_s29 + $0x40] sm:$0xff]  ;;  %v5487_v14 = vld [vmem:[%s7500_s29 + $0x48] sm:$0xff] }
 0x63c   : > { %v2347_v20 = vpop.xlane.xlu0 %2346 }
 0x63d   : > { %v2357_v21 = vsub.f32 %v2113_v1, %v2347_v20  ;;  %v6244_v20 = vpack.c.bf16 %v5487_v14, %v5486_v10 }
 0x63f   : > { %v2361_v22 = vmul.f32 1.442695, %v2357_v21  ;;  %v5488_v21 = vld [vmem:[%s7500_s29 + $0x50] sm:$0xff] }
 0x640   : > { %v2353_v23 = vpop.xlane.xlu0 %2352  ;;  %v2350_v24 = vpop.xlane.xlu1 %2349 }
 0x641   : > { %6391 = vpow2.f32 %v2361_v22  ;;  %v2359_v25 = vsub.f32 %v2265_v4, %v2353_v23  ;;  %v2358_v31 = vsub.f32 %v2189_v3, %v2350_v24  ;;  %v5489_v22 = vld [vmem:[%s7500_s29 + $0x58] sm:$0xff]  ;;  %v5506_v24 = vld [vmem:[%s7463_s7 + $0x40] sm:$0xff] }
 0x642   : > { %v6248_v23 = vpack.c.bf16 %v5489_v22, %v5488_v21 }
 0x643   : > { %v2365_v32 = vmul.f32 1.442695, %v2359_v25  ;;  %v2363_v33 = vmul.f32 1.442695, %v2358_v31  ;;  %v5507_v25 = vld [vmem:[%s7463_s7 + $0x48] sm:$0xff]  ;;  %v5508_v31 = vld [vmem:[%s7463_s7 + $0x50] sm:$0xff] }
 0x644   : > { %v2356_v34 = vpop.xlane.xlu1 %2355 }
 0x645   : > { %6393 = vpow2.f32 %v2365_v32  ;;  %v2360_v35 = vsub.f32 %v2341_v9, %v2356_v34  ;;  %v5481_v9 = vld [vmem:[%s7465_s9 + $0x8] sm:$0xff]  ;;  %v6260_v32 = vpack.c.bf16 %v5507_v25, %v5506_v24 }
 0x646   : > { %6395 = vpow2.f32 %v2363_v33 }
 0x647   : > { %v2367_v36 = vmul.f32 1.442695, %v2360_v35 }
 0x649   : > { %6397 = vpow2.f32 %v2367_v36 }
 0x64b   : > { %v6392_v37 = vpop.eup %6391 }
 0x64c   : > { %v2369_v38 = vsel %vm986_vm2, %v6392_v37, 0.0 }
 0x64d   : > { %2370 = vadd.xlane.f32.xlu0 %v2369_v38 }
 0x64f   : > { %v6394_v39 = vpop.eup %6393 }
 0x650   : > { %v6396_v40 = vpop.eup %6395  ;;  %v2375_v41 = vsel %vm986_vm2, %v6394_v39, 0.0 }
 0x651   : > { %2376 = vadd.xlane.f32.xlu0 %v2375_v41  ;;  %v2372_v42 = vsel %vm986_vm2, %v6396_v40, 0.0 }
 0x652   : > { %2373 = vadd.xlane.f32.xlu1 %v2372_v42 }
 0x653   : > { %v6398_v43 = vpop.eup %6397 }
 0x654   : > { %v2378_v44 = vsel %vm986_vm2, %v6398_v43, 0.0 }
 0x656   : > { %2379 = vadd.xlane.f32.xlu1 %v2378_v44  ;;  %v5511_v44 = vld [vmem:[%s7464_s8 + $0x2] ss:$0 sm:$0xff] }
 0x6da   : > { %v2371_v45 = vpop.xlane.xlu0 %2370 }
 0x6db   : > { %6399 = vrcp.f32 %v2371_v45 }
 0x6de   : > { %v2377_v46 = vpop.xlane.xlu0 %2376 }
 0x6df   : > { %6401 = vrcp.f32 %v2377_v46  ;;  %v2374_v47 = vpop.xlane.xlu1 %2373 }
 0x6e0   : > { %6403 = vrcp.f32 %v2374_v47 }
 0x6e3   : > { %v2380_v48 = vpop.xlane.xlu1 %2379 }
 0x6e4   : > { %6405 = vrcp.f32 %v2380_v48 }
 0x6e5   : > { %v6400_v49 = vpop.eup %6399 }
 0x6e6   : > { %v2385_v50 = vmul.f32 %v6400_v49, %v2371_v45 }
 0x6e8   : > { %v2389_v51 = vsub.f32 2.0, %v2385_v50 }
 0x6e9   : > { %v6402_v52 = vpop.eup %6401 }
 0x6ea   : > { %v6404_v53 = vpop.eup %6403  ;;  %v2393_v54 = vmul.f32 %v6400_v49, %v2389_v51  ;;  %v2387_v58 = vmul.f32 %v6402_v52, %v2377_v46 }
 0x6eb   : > { %v2386_v59 = vmul.f32 %v6404_v53, %v2374_v47  ;;  %v5491_v47 = vld [vmem:[%s7460_s4 + $0x2] ss:$0 sm:$0xff] }
 0x6ec   : > { %v2397_v60 = vmul.f32 %v6392_v37, %v2393_v54  ;;  %v2391_v61 = vsub.f32 2.0, %v2387_v58 }
 0x6ed   : > { %v2390_v63 = vsub.f32 2.0, %v2386_v59 }
 0x6ee   : > { %v6406_v1 = vpop.eup %6405  ;;  %v2395_v55 = vmul.f32 %v6402_v52, %v2391_v61  ;;  %5955 = vmatmul.mubr.msk.f32.vlgmr.msra.gmra.mrb[28].mxu1 %vm986_vm2, %v2397_v60 }
 0x6ef   : > { %v2394_v2 = vmul.f32 %v6404_v53, %v2390_v63  ;;  %v2388_v3 = vmul.f32 %v6406_v1, %v2380_v48  ;;  %5963 = vmatpush3.msra.mxu1 %v2033_v62  ;;  %5964 = vmatprep.mubr.msk.f32.mxu1 %vm6532_vm1, %v6531_v28 }
 0x6f0   : > { %v2399_v4 = vmul.f32 %v6394_v39, %v2395_v55  ;;  %6245 = vmatprep.subr.bf16.mxu1 %v6244_v20 }
 0x6f1   : > { %v2398_v5 = vmul.f32 %v6396_v40, %v2394_v2  ;;  %v2392_v6 = vsub.f32 2.0, %v2388_v3 }
 0x6f2   : > { %5965 = vmatmul.mubr.msk.f32.vlgmr.msra.gmra.mrb[30].mxu1 %vm986_vm2, %v2399_v4 }
 0x6f3   : > { %v2396_v57 = vmul.f32 %v6406_v1, %v2392_v6  ;;  %5960 = vmatmul.mubr.msk.f32.vlgmr.msra.gmra.mrb[24].mxu0 %vm986_vm2, %v2398_v5  ;;  %5988 = vmatprep.mubr.msk.f32.mxu1 %vm672_vm0, %v6718_v11  ;;  %v5497_v11 = vld [vmem:[%s7461_s5 + $0x48] sm:$0xff] }
 0x6f4   : > { %5968 = vmatpush3.msra.mxu0 %v2038_v7  ;;  %5969 = vmatprep.mubr.msk.f32.mxu0 %vm6532_vm1, %v6531_v28  ;;  %v6252_v0 = vpack.c.bf16 %v5497_v11, %v5496_v56 }
 0x6f5   : > { %v2400_v8 = vmul.f32 %v6398_v43, %v2396_v57  ;;  %5972 = vmatprep.subr.mxu0 %v5481_v9  ;;  %6247 = vmatpush3.bf16.msra.mxu1 %v6244_v20 }
 0x6f6   : > { %6249 = vmatprep.subr.bf16.mxu1 %v6248_v23 }
 0x6f7   : > { %5970 = vmatmul.mubr.msk.f32.vlgmr.msra.gmra.mrb[26].mxu0 %vm986_vm2, %v2400_v8 }
 0x6f8   : > { %5973 = vmatpush3.msra.mxu0 %v5481_v9 }
 0x6f9   : > { %6253 = vmatprep.subr.bf16.mxu0 %v6252_v0  ;;  %6251 = vmatpush3.bf16.msra.mxu1 %v6248_v23 }
 0x6fa   : > { %6261 = vmatprep.subr.bf16.mxu1 %v6260_v32 }
 0x6fc   : > { %5989 = vmatmul.mubr.msk.f32.vlgmr.msra.gmra.mrb[32].mxu1 %vm672_vm0, %v6723_v12  ;;  %v5509_v12 = vld [vmem:[%s7463_s7 + $0x58] sm:$0xff] }
 0x6fd   : > { %5991 = vmatprep.mubr.msk.f32.mxu1 %vm672_vm0, %v6726_v13  ;;  %v6264_v33 = vpack.c.bf16 %v5509_v12, %v5508_v31  ;;  %6263 = vmatpush3.bf16.msra.mxu1 %v6260_v32 }
 0x6ff   : > { %6265 = vmatprep.subr.bf16.mxu1 %v6264_v33 }
 0x700   : > { %5992 = vmatmul.mubr.msk.f32.gmra.mrb[34].mxu1 %vm672_vm0, %v6739_v15 }
 0x701   : > { %6016 = vmatprep.mubr.msk.f32.mxu1 %vm672_vm0, %v6782_v26  ;;  %6267 = vmatpush3.bf16.msra.mxu1 %v6264_v33  ;;  %v5498_v26 = vld [vmem:[%s7461_s5 + $0x50] sm:$0xff] }
 0x702   : > { %6027 = vmatprep.subr.mxu1 %v6531_v28 }
 0x704   : > { %6017 = vmatmul.mubr.msk.f32.vlgmr.msra.gmra.mrb[36].mxu1 %vm672_vm0, %v6787_v27  ;;  %v5499_v27 = vld [vmem:[%s7461_s5 + $0x58] sm:$0xff] }
 0x705   : > { %6019 = vmatprep.mubr.msk.f32.mxu1 %vm672_vm0, %v6794_v29  ;;  %v6256_v29 = vpack.c.bf16 %v5499_v27, %v5498_v26 }
 0x708   : > { %6020 = vmatmul.mubr.msk.f32.gmra.mrb[38].mxu1 %vm672_vm0, %v6799_v30 }
 0x709   : > { %6029 = vmatprep.mubr.msk.f32.mxu1 %vm6532_vm1, %v6531_v28 }
 0x7c1   : > { %v2470_v13 = vpop.f32.mrb[28].mxu1 }
 0x7c2   : > { %v5956_v15 = vpop.f32.mrb[29].mxu1  ;;  %5974 = vmatprep.mubr.msk.f32.mxu0 %vm986_vm2, %v2470_v13 }
 0x7c5   : > { %v2616_v34 = vpop.f32.mrb[30].mxu1 }
 0x7c6   : > { %v2543_v35 = vpop.f32.mrb[24].mxu0  ;;  %v5966_v36 = vpop.f32.mrb[31].mxu1 }
 0x7c7   : > { %v5961_v30 = vpop.f32.mrb[25].mxu0  ;;  %5975 = vmatmul.mubr.msk.f32.vlgmr.msra.gmra.mrb[10].mxu0 %vm986_vm2, %v2543_v35 }
 0x7c8   : > { %5977 = vmatprep.mubr.msk.f32.mxu0 %vm986_vm2, %v2616_v34  ;;  %6255 = vmatpush3.bf16.msra.mxu0 %v6252_v0 }
 0x7c9   : > { %6257 = vmatprep.subr.bf16.mxu0 %v6256_v29 }
 0x7ca   : > { %v2689_v37 = vpop.f32.mrb[26].mxu0 }
 0x7cb   : > { %v5971_v38 = vpop.f32.mrb[27].mxu0  ;;  %5978 = vmatmul.mubr.msk.f32.gmra.mrb[12].mxu0 %vm986_vm2, %v2689_v37 }
 0x7cc   : > { %6259 = vmatpush3.bf16.msra.mxu0 %v6256_v29  ;;  %6002 = vmatprep.mubr.msk.f32.mxu0 %vm672_vm0, %v6742_v16 }
 0x7cd   : > { %6022 = vmatprep.subr.mxu0 %v6531_v28 }
 0x7cf   : > { %6003 = vmatmul.mubr.msk.f32.vlgmr.msra.gmra.mrb[28].mxu0 %vm672_vm0, %v6749_v17  ;;  %v5990_v39 = vpop.f32.mrb[32].mxu1 }
 0x7d0   : > { %6005 = vmatprep.mubr.msk.f32.mxu0 %vm672_vm0, %v6752_v18  ;;  %v2875_v40 = vpop.f32.mrb[33].mxu1  ;;  %v2881_v52 = vadd.f32 %v5990_v39, %v5491_v47 }
 0x7d1   : > { %v2876_v53 = vadd.f32 %v5491_v47, %v2875_v40 }
 0x7d3   : > { %6006 = vmatmul.mubr.msk.f32.gmra.mrb[30].mxu0 %vm672_vm0, %v6759_v19  ;;  %v5993_v41 = vpop.f32.mrb[34].mxu1  ;;  %v5501_v19 = vld [vmem:[%s7462_s6 + $0x2] ss:$0 sm:$0xff] }
 0x7d4   : > { %6024 = vmatprep.mubr.msk.f32.mxu0 %vm6532_vm1, %v6531_v28  ;;  %v2885_v42 = vpop.f32.mrb[35].mxu1  ;;  %v2891_v61 = vadd.f32 %v5993_v41, %v5491_v47 }
 0x7d5   : > { %v2886_v62 = vadd.f32 %v5491_v47, %v2885_v42 }
 0x7d7   : > { %v6018_v43 = vpop.f32.mrb[36].mxu1 }
 0x7d8   : > { %v3071_v16 = vpop.f32.mrb[37].mxu1  ;;  %v3077_v63 = vadd.f32 %v6018_v43, %v5511_v44 }
 0x7d9   : > { %v3072_v1 = vadd.f32 %v5511_v44, %v3071_v16 }
 0x7db   : > { %v6021_v17 = vpop.f32.mrb[38].mxu1 }
 0x7dc   : > { %v7068_v45 = vadd.f32 %v6021_v17, %v5511_v44  ;;  %v3081_v18 = vpop.f32.mrb[39].mxu1 }
 0x7dd   : > { %v7070_v46 = vadd.f32 %v5511_v44, %v3081_v18 }
 0x8a2   : > { %v6004_v48 = vpop.f32.mrb[28].mxu0 }
 0x8a3   : > { %v2979_v49 = vadd.f32 %v6004_v48, %v5501_v19  ;;  %v2973_v50 = vpop.f32.mrb[29].mxu0 }
 0x8a4   : > { %v2974_v51 = vadd.f32 %v5501_v19, %v2973_v50 }
 0x8a5   : > { %6028 = vmatpush3.xpose.msk.msra.mxu1 %vm986_vm2, %v2979_v49 }
 0x8a6   : > { %v6007_v54 = vpop.f32.mrb[30].mxu0  ;;  %6023 = vmatpush3.xpose.msk.msra.mxu0 %vm986_vm2, %v2974_v51  ;;  %6037 = vmatprep.subr.mxu1 %v6531_v28 }
 0x8a7   : > { %v2989_v58 = vadd.f32 %v6007_v54, %v5501_v19  ;;  %v2983_v59 = vpop.f32.mrb[31].mxu0  ;;  %6032 = vmatprep.subr.mxu0 %v6531_v28 }
 0x8a8   : > { %v2984_v60 = vadd.f32 %v5501_v19, %v2983_v59  ;;  %6030 = vmatmul.mubr.msk.f32.vlgmr.msra.gmra.mrb[40].mxu1 %vm986_vm2, %v2881_v52 }
 0x8a9   : > { %6025 = vmatmul.mubr.msk.f32.vlgmr.msra.gmra.mrb[32].mxu0 %vm986_vm2, %v2876_v53  ;;  %6038 = vmatpush3.xpose.msk.msra.mxu1 %vm986_vm2, %v2989_v58 }
 0x8aa   : > { %6033 = vmatpush3.xpose.msk.msra.mxu0 %vm986_vm2, %v2984_v60  ;;  %6039 = vmatprep.mubr.msk.f32.mxu1 %vm6532_vm1, %v6531_v28  ;;  %v7119_v60 = vld [vmem:[%s6709_s23] sm:$0xff] }
 0x8ab   : > { %6034 = vmatprep.mubr.msk.f32.mxu0 %vm6532_vm1, %v6531_v28  ;;  %6042 = vmatprep.subr.mxu0 %v6531_v28 }
 0x8ac   : > { %6040 = vmatmul.mubr.msk.f32.vlgmr.msra.gmra.mrb[42].mxu1 %vm986_vm2, %v2891_v61  ;;  %6047 = vmatprep.subr.mxu1 %v6531_v28  ;;  %v5544_v61 = vld [vmem:[%s7461_s5 + $0x68] sm:$0xff] }
 0x8ad   : > { %6035 = vmatmul.mubr.msk.f32.vlgmr.msra.gmra.mrb[34].mxu0 %vm986_vm2, %v2886_v62  ;;  %6048 = vmatpush3.msra.mxu1 %v3077_v63  ;;  %v5533_v63 = vld [vmem:[%s7500_s29 + $0x60] sm:$0xff] }
 0x8ae   : > { %6043 = vmatpush3.msra.mxu0 %v3072_v1  ;;  %6049 = vmatprep.mubr.msk.f32.mxu1 %vm6532_vm1, %v6531_v28  ;;  %v5534_v1 = vld [vmem:[%s7500_s29 + $0x68] sm:$0xff] }
 0x8af   : > { %6057 = vmatprep.subr.mxu1 %v6531_v28  ;;  %6044 = vmatprep.mubr.msk.f32.mxu0 %vm6532_vm1, %v6531_v28 }
 0x8b0   : > { %6052 = vmatprep.subr.mxu0 %v6531_v28 }
 0x97b   : > { %v3238_v55 = vpop.f32.mrb[40].mxu1 }
 0x97c   : > { %v3162_v2 = vpop.f32.mrb[32].mxu0  ;;  %v6031_v3 = vpop.f32.mrb[41].mxu1  ;;  %v3397_v4 = vsel %vm986_vm2, %v3238_v55, -inf }
 0x97d   : > { %3398 = vmax.xlane.f32.xlu1 %v3397_v4  ;;  %v6026_v5 = vpop.f32.mrb[33].mxu0  ;;  %v3394_v6 = vsel %vm986_vm2, %v3162_v2, -inf  ;;  %v5536_v3 = vld [vmem:[%s7500_s29 + $0x78] sm:$0xff] }
 0x97e   : > { %3395 = vmax.xlane.f32.xlu0 %v3394_v6  ;;  %v7145_v5 = vld [vmem:[%s6709_s23 + $0x8] sm:$0xff]  ;;  %v7150_v6 = vld [vmem:[%s6709_s23 + $0x10] sm:$0xff] }
 0x97f   : > { %v3390_v7 = vpop.f32.mrb[42].mxu1 }
 0x980   : > { %v3314_v57 = vpop.f32.mrb[34].mxu0  ;;  %v6041_v8 = vpop.f32.mrb[43].mxu1  ;;  %v3403_v9 = vsel %vm986_vm2, %v3390_v7, -inf }
 0x981   : > { %3404 = vmax.xlane.f32.xlu1 %v3403_v9  ;;  %v6036_v56 = vpop.f32.mrb[35].mxu0  ;;  %v3400_v11 = vsel %vm986_vm2, %v3314_v57, -inf  ;;  %v5555_v8 = vld [vmem:[%s7463_s7 + $0x70] sm:$0xff] }
 0x982   : > { %3401 = vmax.xlane.f32.xlu0 %v3400_v11  ;;  %v5556_v56 = vld [vmem:[%s7463_s7 + $0x78] sm:$0xff] }
 0x983   : > { %v6288_v11 = vpack.c.bf16 %v5556_v56, %v5555_v8 }
 0xa0a   : > { %v3399_v0 = vpop.xlane.xlu1 %3398 }
 0xa0b   : > { %v3407_v10 = vsub.f32 %v3238_v55, %v3399_v0  ;;  %v3396_v14 = vpop.xlane.xlu0 %3395  ;;  %v6268_v55 = vpack.c.bf16 %v5534_v1, %v5533_v63  ;;  %v7167_v0 = vld [vmem:[%s6709_s23 + $0x18] sm:$0xff]  ;;  %s628_s23 = scalar_lea.vmem [#allocation2], %s5400_s0  ;;  %s6533_s0 = smov [#allocation2]  }
 0xa0c   : > { %v3406_v20 = vsub.f32 %v3162_v2, %v3396_v14  ;;  %v5535_v2 = vld [vmem:[%s7500_s29 + $0x70] sm:$0xff]  ;;  %v6460_v14 = vld [vmem:[%s6779_s3 + $0x8] sm:$0xff]  ;;  %s5310_s20 = sshll.u32 %s628_s23, 4  ;;  %s6471_s19 = sshll.u32 %s6533_s0, 4  ;;  %s7409_s20 = int_to_ptr.vmem [resolvable:$true] %s5310_s20  ;;  %s6472_s19 = int_to_ptr.vmem [resolvable:$false] %s6471_s19 }
 0xa0d   : > { %v3412_v21 = vmul.f32 1.442695, %v3407_v10  ;;  %v6272_v4 = vpack.c.bf16 %v5536_v3, %v5535_v2  ;;  %v6459_v10 = vld [vmem:[%s6779_s3] sm:$0xff]  ;;  %s6467_s22 = scalar_lea.vmem %s7409_s20, 512  ;;  %s6473_s25 = scalar_lea.vmem %s6472_s19, 1024 }
 0xa0e   : > { %v3410_v22 = vmul.f32 1.442695, %v3406_v20  ;;  %v3405_v23 = vpop.xlane.xlu1 %3404  ;;  %v6461_v20 = vld [vmem:[%s6779_s3 + $0x10] sm:$0xff]  ;;  %p6468_p11 = scmp.ne.s32.totalorder %s7409_s20, %s6467_s22  ;;  %p6474_p0 = scmp.lt.s32.totalorder %s7409_s20, %s6472_s19 }
 0xa0f   : > { %6407 = vpow2.f32 %v3412_v21  ;;  %v3409_v24 = vsub.f32 %v3390_v7, %v3405_v23  ;;  %v3402_v25 = vpop.xlane.xlu0 %3401  ;;  %v5553_v7 = vld [vmem:[%s7463_s7 + $0x60] sm:$0xff]  ;;  %v6462_v21 = vld [vmem:[%s6779_s3 + $0x18] sm:$0xff]  ;;  %p6475_p1 = scmp.lt.s32.totalorder %s6473_s25, %s6467_s22 }
 0xa10   : > { %6409 = vpow2.f32 %v3410_v22  ;;  %v3408_v31 = vsub.f32 %v3314_v57, %v3402_v25  ;;  %v5554_v57 = vld [vmem:[%s7463_s7 + $0x68] sm:$0xff]  ;;  %v5545_v22 = vld [vmem:[%s7461_s5 + $0x70] sm:$0xff]  ;;  %v5546_v23 = vld [vmem:[%s7461_s5 + $0x78] sm:$0xff]  ;;  %p6469_p12 = pnand %p6468_p11, %p6674_p5 }
 0xa11   : > { %v3416_v32 = vmul.f32 1.442695, %v3409_v24  ;;  %v6284_v9 = vpack.c.bf16 %v5554_v57, %v5553_v7  ;;  %p6476_p2 = por %p6475_p1, %p6474_p0 }
 0xa12   : > { %v3414_v12 = vmul.f32 1.442695, %v3408_v31  ;;  %p6470_p13 = pneg %p6469_p12 }
 0xa13   : > { %6411 = vpow2.f32 %v3416_v32  ;;  %v6280_v32 = vpack.c.bf16 %v5546_v23, %v5545_v22 }
 0xa14   : > { %6413 = vpow2.f32 %v3414_v12  ;;  %p6477_p3 = pnand %p6476_p2, %p6470_p13 }
 0xa19   : > { %v6408_v33 = vpop.eup %6407 }
 0xa1a   : > { %v6410_v13 = vpop.eup %6409  ;;  %v3421_v15 = vsel %vm986_vm2, %v6408_v33, 0.0 }
 0xa1b   : > { %3422 = vadd.xlane.f32.xlu1 %v3421_v15  ;;  %v3418_v26 = vsel %vm986_vm2, %v6410_v13, 0.0 }
 0xa1c   : > { %3419 = vadd.xlane.f32.xlu0 %v3418_v26 }
 0xa1d   : > { %v6412_v27 = vpop.eup %6411 }
 0xa1e   : > { %v6414_v34 = vpop.eup %6413  ;;  %v3427_v29 = vsel %vm986_vm2, %v6412_v27, 0.0 }
 0xa1f   : > { %3428 = vadd.xlane.f32.xlu1 %v3427_v29  ;;  %v3424_v35 = vsel %vm986_vm2, %v6414_v34, 0.0  ;;  %v6465_v29 = vld [vmem:[%s6732_s26 + $0x10] sm:$0xff] }
 0xa20   : > { %3425 = vadd.xlane.f32.xlu0 %v3424_v35  ;;  %v6466_v35 = vld [vmem:[%s6732_s26 + $0x18] sm:$0xff] }
 0xaa8   : > { %v3423_v36 = vpop.xlane.xlu1 %3422 }
 0xaa9   : > { %6415 = vrcp.f32 %v3423_v36  ;;  %v3420_v30 = vpop.xlane.xlu0 %3419 }
 0xaaa   : > { %6417 = vrcp.f32 %v3420_v30 }
 0xaac   : > { %v3429_v37 = vpop.xlane.xlu1 %3428 }
 0xaad   : > { %6419 = vrcp.f32 %v3429_v37  ;;  %v3426_v38 = vpop.xlane.xlu0 %3425 }
 0xaae   : > { %6421 = vrcp.f32 %v3426_v38 }
 0xab3   : > { %v6416_v39 = vpop.eup %6415 }
 0xab4   : > { %v6418_v40 = vpop.eup %6417  ;;  %v3435_v41 = vmul.f32 %v6416_v39, %v3423_v36 }
 0xab5   : > { %v3434_v42 = vmul.f32 %v6418_v40, %v3420_v30 }
 0xab6   : > { %v3439_v43 = vsub.f32 2.0, %v3435_v41 }
 0xab7   : > { %v6420_v16 = vpop.eup %6419  ;;  %v3438_v44 = vsub.f32 2.0, %v3434_v42  ;;  %v5538_v42 = vld [vmem:[%s7460_s4 + $0x3] ss:$0 sm:$0xff] }
 0xab8   : > { %v6422_v17 = vpop.eup %6421  ;;  %v3443_v18 = vmul.f32 %v6416_v39, %v3439_v43  ;;  %v3437_v19 = vmul.f32 %v6420_v16, %v3429_v37 }
 0xab9   : > { %v3442_v47 = vmul.f32 %v6418_v40, %v3438_v44  ;;  %v3436_v48 = vmul.f32 %v6422_v17, %v3426_v38  ;;  %v5548_v40 = vld [vmem:[%s7462_s6 + $0x3] ss:$0 sm:$0xff] }
 0xaba   : > { %v3447_v49 = vmul.f32 %v6408_v33, %v3443_v18  ;;  %v3441_v50 = vsub.f32 2.0, %v3437_v19 }
 0xabb   : > { %v3446_v51 = vmul.f32 %v6410_v13, %v3442_v47  ;;  %v3440_v52 = vsub.f32 2.0, %v3436_v48 }
 0xabc   : > { %v3445_v53 = vmul.f32 %v6420_v16, %v3441_v50  ;;  %6050 = vmatmul.mubr.msk.f32.vlgmr.msra.gmra.mrb[44].mxu1 %vm986_vm2, %v3447_v49 }
 0xabd   : > { %v3444_v54 = vmul.f32 %v6422_v17, %v3440_v52  ;;  %6058 = vmatpush3.msra.mxu1 %v7068_v45  ;;  %6045 = vmatmul.mubr.msk.f32.vlgmr.msra.gmra.mrb[36].mxu0 %vm986_vm2, %v3446_v51  ;;  %v5528_v45 = vld [vmem:[%s7465_s9 + $0x10] sm:$0xff]  ;;  %v7220_v51 = vld [vmem:[%s7464_s8 + $0x3] ss:$0 sm:$0xff] }
 0xabe   : > { %v3449_v58 = vmul.f32 %v6412_v27, %v3445_v53  ;;  %6053 = vmatpush3.msra.mxu0 %v7070_v46  ;;  %6059 = vmatprep.mubr.msk.f32.mxu1 %vm6532_vm1, %v6531_v28  ;;  %v5543_v46 = vld [vmem:[%s7461_s5 + $0x60] sm:$0xff] }
 0xabf   : > { %v3448_v59 = vmul.f32 %v6414_v34, %v3444_v54  ;;  %6054 = vmatprep.mubr.msk.f32.mxu0 %vm6532_vm1, %v6531_v28  ;;  %6062 = vmatprep.subr.mxu0 %v5528_v45  ;;  %v6276_v62 = vpack.c.bf16 %v5544_v61, %v5543_v46  ;;  %v6463_v27 = vld [vmem:[%s6732_s26] sm:$0xff]  ;;  %v6464_v34 = vld [vmem:[%s6732_s26 + $0x8] sm:$0xff]  ;;  %s7407_s26 = scalar_lea.hbm %s7505_s28, %s5599_s21 }
 0xac0   : > { %6060 = vmatmul.mubr.msk.f32.vlgmr.msra.gmra.mrb[46].mxu1 %vm986_vm2, %v3449_v58  ;;  %6269 = vmatprep.subr.bf16.mxu1 %v6268_v55 }
 0xac1   : > { %6055 = vmatmul.mubr.msk.f32.vlgmr.msra.gmra.mrb[38].mxu0 %vm986_vm2, %v3448_v59  ;;  %6078 = vmatprep.mubr.msk.f32.mxu1 %vm672_vm0, %v7119_v60 }
 0xac2   : > { %6063 = vmatpush3.msra.mxu0 %v5528_v45  ;;  %6271 = vmatpush3.bf16.msra.mxu1 %v6268_v55 }
 0xac3   : > { %6277 = vmatprep.subr.bf16.mxu0 %v6276_v62  ;;  %6273 = vmatprep.subr.bf16.mxu1 %v6272_v4 }
 0xac6   : > { %6275 = vmatpush3.bf16.msra.mxu1 %v6272_v4 }
 0xac7   : > { %6285 = vmatprep.subr.bf16.mxu1 %v6284_v9 }
 0xac9   : > { %6079 = vmatmul.mubr.msk.f32.vlgmr.msra.gmra.mrb[48].mxu1 %vm672_vm0, %v7145_v5 }
 0xaca   : > { %6081 = vmatprep.mubr.msk.f32.mxu1 %vm672_vm0, %v7150_v6  ;;  %6287 = vmatpush3.bf16.msra.mxu1 %v6284_v9 }
 0xacb   : > { %6289 = vmatprep.subr.bf16.mxu1 %v6288_v11 }
 0xacd   : > { %6082 = vmatmul.mubr.msk.f32.gmra.mrb[50].mxu1 %vm672_vm0, %v7167_v0 }
 0xace   : > { %6106 = vmatprep.mubr.msk.f32.mxu1 %vm672_vm0, %v6459_v10  ;;  %6291 = vmatpush3.bf16.msra.mxu1 %v6288_v11 }
 0xacf   : > { %6122 = vmatprep.subr.mxu1 %v6531_v28 }
 0xad1   : > { %6107 = vmatmul.mubr.msk.f32.vlgmr.msra.gmra.mrb[52].mxu1 %vm672_vm0, %v6460_v14 }
 0xad2   : > { %6109 = vmatprep.mubr.msk.f32.mxu1 %vm672_vm0, %v6461_v20 }
 0xad5   : > { %6110 = vmatmul.mubr.msk.f32.gmra.mrb[54].mxu1 %vm672_vm0, %v6462_v21 }
 0xad6   : > { %6124 = vmatprep.mubr.msk.f32.mxu1 %vm6532_vm1, %v6531_v28 }
 0xb8f   : > { %v3592_v24 = vpop.f32.mrb[44].mxu1 }
 0xb90   : > { %v3519_v25 = vpop.f32.mrb[36].mxu0  ;;  %v6051_v31 = vpop.f32.mrb[45].mxu1 }
 0xb91   : > { %v6046_v12 = vpop.f32.mrb[37].mxu0  ;;  %6064 = vmatprep.mubr.msk.f32.mxu0 %vm986_vm2, %v3519_v25 }
 0xb92   : > { %6065 = vmatmul.mubr.msk.f32.vlgmr.msra.gmra.mrb[10].mxu0 %vm986_vm2, %v3592_v24 }
 0xb93   : > { %v3738_v33 = vpop.f32.mrb[46].mxu1  ;;  %6279 = vmatpush3.bf16.msra.mxu0 %v6276_v62 }
 0xb94   : > { %v3665_v13 = vpop.f32.mrb[38].mxu0  ;;  %v6061_v15 = vpop.f32.mrb[47].mxu1  ;;  %6281 = vmatprep.subr.bf16.mxu0 %v6280_v32 }
 0xb95   : > { %v6056_v26 = vpop.f32.mrb[39].mxu0  ;;  %6067 = vmatprep.mubr.msk.f32.mxu0 %vm986_vm2, %v3665_v13 }
 0xb96   : > { %6068 = vmatmul.mubr.msk.f32.gmra.mrb[12].mxu0 %vm986_vm2, %v3738_v33 }
 0xb97   : > { %6283 = vmatpush3.bf16.msra.mxu0 %v6280_v32  ;;  %6092 = vmatprep.mubr.msk.f32.mxu0 %vm672_vm0, %v6463_v27 }
 0xb98   : > { %6112 = vmatprep.subr.mxu0 %v6531_v28 }
 0xb9a   : > { %6093 = vmatmul.mubr.msk.f32.vlgmr.msra.gmra.mrb[40].mxu0 %vm672_vm0, %v6464_v34 }
 0xb9b   : > { %6095 = vmatprep.mubr.msk.f32.mxu0 %vm672_vm0, %v6465_v29 }
 0xb9c   : > { %v6080_v36 = vpop.f32.mrb[48].mxu1 }
 0xb9d   : > { %v3924_v30 = vpop.f32.mrb[49].mxu1  ;;  %v3930_v50 = vadd.f32 %v6080_v36, %v5538_v42 }
 0xb9e   : > { %6096 = vmatmul.mubr.msk.f32.gmra.mrb[42].mxu0 %vm672_vm0, %v6466_v35  ;;  %v3925_v44 = vadd.f32 %v5538_v42, %v3924_v30 }
 0xb9f   : > { %6114 = vmatprep.mubr.msk.f32.mxu0 %vm6532_vm1, %v6531_v28 }
 0xba0   : > { %v6083_v37 = vpop.f32.mrb[50].mxu1 }
 0xba1   : > { %v3934_v38 = vpop.f32.mrb[51].mxu1  ;;  %v3940_v52 = vadd.f32 %v6083_v37, %v5538_v42 }
 0xba2   : > { %v3935_v48 = vadd.f32 %v5538_v42, %v3934_v38 }
 0xba4   : > { %v6108_v39 = vpop.f32.mrb[52].mxu1 }
 0xba5   : > { %v4126_v53 = vadd.f32 %v6108_v39, %v7220_v51  ;;  %v4120_v54 = vpop.f32.mrb[53].mxu1 }
 0xba6   : > { %v4121_v58 = vadd.f32 %v7220_v51, %v4120_v54 }
 0xba8   : > { %v7237_v59 = vpop.f32.mrb[54].mxu1 }
 0xba9   : > { %v7239_v45 = vpop.f32.mrb[55].mxu1 }
 0xc6d   : > { %v6094_v41 = vpop.f32.mrb[40].mxu0 }
 0xc6e   : > { %v4022_v43 = vpop.f32.mrb[41].mxu0  ;;  %v4028_v19 = vadd.f32 %v6094_v41, %v5548_v40 }
 0xc6f   : > { %v4023_v16 = vadd.f32 %v5548_v40, %v4022_v43 }
 0xc71   : > { %v6097_v17 = vpop.f32.mrb[42].mxu0  ;;  %6113 = vmatpush3.xpose.msk.msra.mxu0 %vm986_vm2, %v4023_v16 }
 0xc72   : > { %v4032_v18 = vpop.f32.mrb[43].mxu0  ;;  %6117 = vmatprep.subr.mxu0 %v6531_v28  ;;  %v4038_v49 = vadd.f32 %v6097_v17, %v5548_v40 }
 0xc73   : > { %v4033_v47 = vadd.f32 %v5548_v40, %v4032_v18  ;;  %v4131_v18 = vadd.f32 %v7220_v51, %v7239_v45 }
 0xc74   : > { %6115 = vmatmul.mubr.msk.f32.vlgmr.msra.gmra.mrb[44].mxu0 %vm986_vm2, %v3925_v44 }
 0xc75   : > { %6118 = vmatpush3.xpose.msk.msra.mxu0 %vm986_vm2, %v4028_v19  ;;  %6123 = vmatpush3.xpose.msk.msra.mxu1 %vm986_vm2, %v4033_v47 }
 0xc76   : > { %6119 = vmatprep.mubr.msk.f32.mxu0 %vm6532_vm1, %v6531_v28  ;;  %6127 = vmatprep.subr.mxu0 %v6531_v28 }
 0xc77   : > { %6132 = vmatprep.subr.mxu1 %v6531_v28 }
 0xc78   : > { %6120 = vmatmul.mubr.msk.f32.vlgmr.msra.gmra.mrb[46].mxu0 %vm986_vm2, %v3930_v50  ;;  %6125 = vmatmul.mubr.msk.f32.vlgmr.msra.gmra.mrb[56].mxu1 %vm986_vm2, %v3935_v48 }
 0xc79   : > { %6128 = vmatpush3.xpose.msk.msra.mxu0 %vm986_vm2, %v4038_v49  ;;  %6129 = vmatprep.mubr.msk.f32.mxu0 %vm6532_vm1, %v6531_v28 }
 0xc7a   : > { %6137 = vmatprep.subr.mxu0 %v6531_v28  ;;  %6134 = vmatprep.mubr.msk.f32.mxu1 %vm6532_vm1, %v6531_v28 }
 0xc7b   : > { %6133 = vmatpush3.msra.mxu1 %v4121_v58  ;;  %v4136_v58 = vadd.f32 %v7237_v59, %v7220_v51 }
 0xc7c   : > { %6130 = vmatmul.mubr.msk.f32.vlgmr.msra.gmra.mrb[48].mxu0 %vm986_vm2, %v3940_v52  ;;  %6142 = vmatprep.subr.mxu1 %v6531_v28 }
 0xc7d   : > { %6138 = vmatpush3.msra.mxu0 %v4126_v53  ;;  %6139 = vmatprep.mubr.msk.f32.mxu0 %vm6532_vm1, %v6531_v28 }
 0xc7e   : > { %6147 = vmatprep.subr.mxu0 %v6531_v28 }
 0xd47   : > { %v4211_v46 = vpop.f32.mrb[44].mxu0 }
 0xd48   : > { %v4443_v61 = vsel %vm986_vm2, %v4211_v46, -inf  ;;  %v6116_v62 = vpop.f32.mrb[45].mxu0 }
 0xd49   : > { %4444 = vmax.xlane.f32.xlu0 %v4443_v61  ;;  %v5575_v61 = vld [vmem:[%s7465_s9 + $0x18] sm:$0xff] }
 0xd4b   : > { %v4287_v63 = vpop.f32.mrb[46].mxu0  ;;  %v4363_v1 = vpop.f32.mrb[56].mxu1 }
 0xd4c   : > { %v6121_v55 = vpop.f32.mrb[47].mxu0  ;;  %v4449_v2 = vsel %vm986_vm2, %v4363_v1, -inf  ;;  %v4446_v3 = vsel %vm986_vm2, %v4287_v63, -inf  ;;  %v6126_v4 = vpop.f32.mrb[57].mxu1 }
 0xd4d   : > { %4450 = vmax.xlane.f32.xlu0 %v4449_v2  ;;  %4447 = vmax.xlane.f32.xlu1 %v4446_v3  ;;  %v5438_v3 = vld [vmem:[%s7466_s10] ss:$0 sm:$0xff] }
 0xd4f   : > { %v4439_v7 = vpop.f32.mrb[48].mxu0 }
 0xd50   : > { %v4452_v57 = vsel %vm986_vm2, %v4439_v7, -inf  ;;  %v6131_v8 = vpop.f32.mrb[49].mxu0 }
 0xd51   : > { %4453 = vmax.xlane.f32.xlu1 %v4452_v57 }
 0xdd6   : > { %v4445_v9 = vpop.xlane.xlu0 %4444 }
 0xdd7   : > { %v4455_v56 = vsub.f32 %v4211_v46, %v4445_v9 }
 0xdd9   : > { %v4459_v11 = vmul.f32 1.442695, %v4455_v56 }
 0xdda   : > { %v4451_v10 = vpop.xlane.xlu0 %4450  ;;  %v4448_v14 = vpop.xlane.xlu1 %4447 }
 0xddb   : > { %6423 = vpow2.f32 %v4459_v11  ;;  %v4457_v20 = vsub.f32 %v4363_v1, %v4451_v10  ;;  %v4456_v21 = vsub.f32 %v4287_v63, %v4448_v14 }
 0xddd   : > { %v4463_v22 = vmul.f32 1.442695, %v4457_v20  ;;  %v4461_v23 = vmul.f32 1.442695, %v4456_v21 }
 0xdde   : > { %v4454_v24 = vpop.xlane.xlu1 %4453 }
 0xddf   : > { %6425 = vpow2.f32 %v4463_v22  ;;  %v4458_v25 = vsub.f32 %v4439_v7, %v4454_v24 }
 0xde0   : > { %6427 = vpow2.f32 %v4461_v23 }
 0xde1   : > { %v4465_v31 = vmul.f32 1.442695, %v4458_v25 }
 0xde3   : > { %6429 = vpow2.f32 %v4465_v31 }
 0xde5   : > { %v6424_v32 = vpop.eup %6423 }
 0xde6   : > { %v4467_v12 = vsel %vm986_vm2, %v6424_v32, 0.0 }
 0xde7   : > { %4468 = vadd.xlane.f32.xlu0 %v4467_v12 }
 0xde9   : > { %v6426_v33 = vpop.eup %6425 }
 0xdea   : > { %v6428_v13 = vpop.eup %6427  ;;  %v4473_v15 = vsel %vm986_vm2, %v6426_v33, 0.0 }
 0xdeb   : > { %4474 = vadd.xlane.f32.xlu0 %v4473_v15  ;;  %v4470_v26 = vsel %vm986_vm2, %v6428_v13, 0.0  ;;  %v4981_v15 = vld [vmem:[%s7469_s13] sm:$0xff] }
 0xdec   : > { %4471 = vadd.xlane.f32.xlu1 %v4470_v26  ;;  %v4982_v26 = vld [vmem:[%s7469_s13 + $0x8] sm:$0xff] }
 0xded   : > { %v6430_v27 = vpop.eup %6429 }
 0xdee   : > { %v4476_v34 = vsel %vm986_vm2, %v6430_v27, 0.0 }
 0xdf0   : > { %4477 = vadd.xlane.f32.xlu1 %v4476_v34  ;;  %v4983_v34 = vld [vmem:[%s7469_s13 + $0x10] sm:$0xff] }
 0xe74   : > { %v4469_v29 = vpop.xlane.xlu0 %4468 }
 0xe75   : > { %6431 = vrcp.f32 %v4469_v29 }
 0xe78   : > { %v4475_v35 = vpop.xlane.xlu0 %4474 }
 0xe79   : > { %6433 = vrcp.f32 %v4475_v35  ;;  %v4472_v36 = vpop.xlane.xlu1 %4471 }
 0xe7a   : > { %6435 = vrcp.f32 %v4472_v36 }
 0xe7d   : > { %v4478_v30 = vpop.xlane.xlu1 %4477 }
 0xe7e   : > { %6437 = vrcp.f32 %v4478_v30 }
 0xe7f   : > { %v6432_v37 = vpop.eup %6431 }
 0xe80   : > { %v4483_v38 = vmul.f32 %v6432_v37, %v4469_v29  ;;  %v4984_v29 = vld [vmem:[%s7469_s13 + $0x18] sm:$0xff] }
 0xe82   : > { %v4487_v39 = vsub.f32 2.0, %v4483_v38 }
 0xe83   : > { %v6434_v40 = vpop.eup %6433 }
 0xe84   : > { %v6436_v41 = vpop.eup %6435  ;;  %v4491_v42 = vmul.f32 %v6432_v37, %v4487_v39  ;;  %v4485_v43 = vmul.f32 %v6434_v40, %v4475_v35  ;;  %v6296_v35 = vpack.c.bf16 %v4984_v29, %v4983_v34  ;;  %v5095_v37 = vld [vmem:[%s7471_s15 + $0x10] sm:$0xff]  ;;  %v5096_v39 = vld [vmem:[%s7471_s15 + $0x18] sm:$0xff]  ;;  %v5582_v29 = vld [vmem:[%s7470_s14] ss:$0 sm:$0xff] }
 0xe85   : > { %v4484_v16 = vmul.f32 %v6436_v41, %v4472_v36  ;;  %v5093_v36 = vld [vmem:[%s7471_s15] sm:$0xff] }
 0xe86   : > { %v4495_v44 = vmul.f32 %v6424_v32, %v4491_v42  ;;  %v4489_v17 = vsub.f32 2.0, %v4485_v43  ;;  %v5098_v42 = vld [vmem:[%s7471_s15 + $0x28] sm:$0xff] }
 0xe87   : > { %v4488_v19 = vsub.f32 2.0, %v4484_v16 }
 0xe88   : > { %v6438_v47 = vpop.eup %6437  ;;  %v4493_v48 = vmul.f32 %v6434_v40, %v4489_v17  ;;  %6135 = vmatmul.mubr.msk.f32.vlgmr.msra.gmra.mrb[58].mxu1 %vm986_vm2, %v4495_v44  ;;  %v6304_v40 = vpack.c.bf16 %v5096_v39, %v5095_v37 }
 0xe89   : > { %v4492_v49 = vmul.f32 %v6436_v41, %v4488_v19  ;;  %v4486_v50 = vmul.f32 %v6438_v47, %v4478_v30  ;;  %6143 = vmatpush3.msra.mxu1 %v4131_v18  ;;  %6144 = vmatprep.mubr.msk.f32.mxu1 %vm6532_vm1, %v6531_v28  ;;  %v5094_v30 = vld [vmem:[%s7471_s15 + $0x8] sm:$0xff]  ;;  %v5097_v41 = vld [vmem:[%s7471_s15 + $0x20] sm:$0xff] }
 0xe8a   : > { %v4497_v52 = vmul.f32 %v6426_v33, %v4493_v48  ;;  %v6300_v38 = vpack.c.bf16 %v5094_v30, %v5093_v36  ;;  %v6308_v43 = vpack.c.bf16 %v5098_v42, %v5097_v41 }
 0xe8b   : > { %v4496_v53 = vmul.f32 %v6428_v13, %v4492_v49  ;;  %v4490_v54 = vsub.f32 2.0, %v4486_v50 }
 0xe8c   : > { %6145 = vmatmul.mubr.msk.f32.vlgmr.msra.gmra.mrb[60].mxu1 %vm986_vm2, %v4497_v52 }
 0xe8d   : > { %v4494_v45 = vmul.f32 %v6438_v47, %v4490_v54  ;;  %6140 = vmatmul.mubr.msk.f32.vlgmr.msra.gmra.mrb[50].mxu0 %vm986_vm2, %v4496_v53 }
 0xe8e   : > { %6148 = vmatpush3.msra.mxu0 %v4136_v58  ;;  %6149 = vmatprep.mubr.msk.f32.mxu0 %vm6532_vm1, %v6531_v28 }
 0xe8f   : > { %v4498_v46 = vmul.f32 %v6430_v27, %v4494_v45  ;;  %6152 = vmatprep.subr.mxu0 %v5575_v61  ;;  %v6292_v27 = vpack.c.bf16 %v4982_v26, %v4981_v15 }
 0xe91   : > { %6150 = vmatmul.mubr.msk.f32.vlgmr.msra.gmra.mrb[52].mxu0 %vm986_vm2, %v4498_v46  ;;  %6293 = vmatprep.subr.bf16.mxu1 %v6292_v27 }
 0xe92   : > { %6153 = vmatpush3.msra.mxu0 %v5575_v61  ;;  %6295 = vmatpush3.bf16.msra.mxu1 %v6292_v27 }
 0xe93   : > { %6297 = vmatprep.subr.bf16.mxu1 %v6296_v35  ;;  %6301 = vmatprep.subr.bf16.mxu0 %v6300_v38 }
 0xe96   : > { %6299 = vmatpush3.bf16.msra.mxu1 %v6296_v35 }
 0xf5b   : > { %v4568_v62 = vpop.f32.mrb[58].mxu1 }
 0xf5c   : > { %v6136_v51 = vpop.f32.mrb[59].mxu1  ;;  %6154 = vmatprep.mubr.msk.f32.mxu0 %vm986_vm2, %v4568_v62 }
 0xf5f   : > { %v4714_v59 = vpop.f32.mrb[60].mxu1 }
 0xf60   : > { %v4641_v63 = vpop.f32.mrb[50].mxu0  ;;  %v6146_v1 = vpop.f32.mrb[61].mxu1 }
 0xf61   : > { %v6141_v55 = vpop.f32.mrb[51].mxu0  ;;  %6155 = vmatmul.mubr.msk.f32.vlgmr.msra.gmra.mrb[10].mxu0 %vm986_vm2, %v4641_v63 }
 0xf62   : > { %6157 = vmatprep.mubr.msk.f32.mxu0 %vm986_vm2, %v4714_v59  ;;  %6303 = vmatpush3.bf16.msra.mxu0 %v6300_v38 }
 0xf63   : > { %6305 = vmatprep.subr.bf16.mxu0 %v6304_v40 }
 0xf64   : > { %v4787_v28 = vpop.f32.mrb[52].mxu0 }
 0xf65   : > { %v6151_v2 = vpop.f32.mrb[53].mxu0  ;;  %6158 = vmatmul.mubr.msk.f32.gmra.mrb[12].mxu0 %vm986_vm2, %v4787_v28 }
 0xf66   : > { %6307 = vmatpush3.bf16.msra.mxu0 %v6304_v40 }
 0xf67   : > { %6309 = vmatprep.subr.bf16.mxu0 %v6308_v43 }
 0xf6a   : > { %6311 = vmatpush3.bf16.msra.mxu0 %v6308_v43 }
0x1034   : > { %v6156_v4 = vpop.f32.mrb[10].mxu0 }
0x1035   : > { %v6316_v7 = vadd.f32 %v6156_v4, %v5438_v3  ;;  %v4871_v57 = vpop.f32.mrb[11].mxu0 }
0x1036   : > { %v6317_v8 = vadd.f32 %v5438_v3, %v4871_v57 }
0x1037   : > { %v7273_v9 = vadd.f32 %v7145_v5, %v6316_v7 }
0x1038   : > { %v7276_v56 = vadd.f32 %v7119_v60, %v6317_v8  ;;  %v6159_v11 = vpop.f32.mrb[12].mxu0 }
0x1039   : > { %v6318_v10 = vadd.f32 %v6159_v11, %v5438_v3  ;;  %v4881_v14 = vpop.f32.mrb[13].mxu0  ;;  %v4903_v20 = vsel %vm672_vm0, %v7273_v9, 0.0  ;;  %v4918_v21 = vmul.f32 %v7273_v9, %v7273_v9 }
0x103a   : > { %v6319_v22 = vadd.f32 %v5438_v3, %v4881_v14  ;;  %4904 = vadd.xlane.f32.xlu1 %v4903_v20  ;;  %v4900_v23 = vsel %vm672_vm0, %v7276_v56, 0.0  ;;  %v4917_v5 = vmul.f32 %v7276_v56, %v7276_v56  ;;  %v5580_v14 = vld [vmem:[%s7467_s11] ss:$0 sm:$0xff] }
0x103b   : > { %4901 = vadd.xlane.f32.xlu0 %v4900_v23  ;;  %v7287_v60 = vadd.f32 %v7167_v0, %v6318_v10  ;;  %v4924_v24 = vsel %vm672_vm0, %v4918_v21, 0.0  ;;  %v5581_v23 = vld [vmem:[%s7468_s12] ss:$0 sm:$0xff] }
0x103c   : > { %v7291_v25 = vadd.f32 %v7150_v6, %v6319_v22  ;;  %v4921_v31 = vsel %vm672_vm0, %v4917_v5, 0.0 }
0x103d   : > { %v4909_v32 = vsel %vm672_vm0, %v7287_v60, 0.0  ;;  %v4920_v12 = vmul.f32 %v7287_v60, %v7287_v60 }
0x103e   : > { %4925 = vadd.xlane.f32.xlu1 %v4924_v24  ;;  %v4906_v0 = vsel %vm672_vm0, %v7291_v25, 0.0  ;;  %v4919_v33 = vmul.f32 %v7291_v25, %v7291_v25 }
0x103f   : > { %4922 = vadd.xlane.f32.xlu0 %v4921_v31  ;;  %v4930_v6 = vsel %vm672_vm0, %v4920_v12, 0.0 }
0x1040   : > { %v4927_v13 = vsel %vm672_vm0, %v4919_v33, 0.0 }
0x1042   : > { %4910 = vadd.xlane.f32.xlu1 %v4909_v32 }
0x1043   : > { %4907 = vadd.xlane.f32.xlu0 %v4906_v0 }
0x1046   : > { %4931 = vadd.xlane.f32.xlu1 %v4930_v6 }
0x1047   : > { %4928 = vadd.xlane.f32.xlu0 %v4927_v13 }
0x10c7   : > { %v4905_v16 = vpop.xlane.xlu1 %4904 }
0x10c8   : > { %v4914_v44 = vmul.f32 0.03125, %v4905_v16  ;;  %v4902_v17 = vpop.xlane.xlu0 %4901 }
0x10c9   : > { %v4913_v18 = vmul.f32 0.03125, %v4902_v17  ;;  %v5587_v17 = vld [vmem:[%s7472_s16] ss:$0 sm:$0xff] }
0x10ca   : > { %v4938_v47 = vmul.f32 %v4914_v44, %v4914_v44  ;;  %v4946_v8 = vsub.f32 %v7273_v9, %v4914_v44 }
0x10cb   : > { %v4926_v19 = vpop.xlane.xlu1 %4925  ;;  %v4937_v50 = vmul.f32 %v4913_v18, %v4913_v18  ;;  %v4945_v10 = vsub.f32 %v7276_v56, %v4913_v18 }
0x10cc   : > { %v4934_v48 = vmul.f32 0.03125, %v4926_v19  ;;  %v4923_v49 = vpop.xlane.xlu0 %4922 }
0x10cd   : > { %v4933_v52 = vmul.f32 0.03125, %v4923_v49 }
0x10ce   : > { %v4942_v53 = vsub.f32 %v4934_v48, %v4938_v47 }
0x10cf   : > { %v4941_v54 = vsub.f32 %v4933_v52, %v4937_v50  ;;  %v4911_v58 = vpop.xlane.xlu1 %4910 }
0x10d0   : > { %v4950_v45 = vadd.f32 1e-05, %v4942_v53  ;;  %v4916_v46 = vmul.f32 0.03125, %v4911_v58  ;;  %v4908_v61 = vpop.xlane.xlu0 %4907 }
0x10d1   : > { %v4949_v62 = vadd.f32 1e-05, %v4941_v54  ;;  %v4915_v51 = vmul.f32 0.03125, %v4908_v61 }
0x10d2   : > { %6439 = vrsqrt.f32 %v4950_v45  ;;  %v4940_v63 = vmul.f32 %v4916_v46, %v4916_v46  ;;  %v4948_v9 = vsub.f32 %v7287_v60, %v4916_v46  ;;  %v5099_v60 = vld [vmem:[%s7471_s15 + $0x30] sm:$0xff] }
0x10d3   : > { %6441 = vrsqrt.f32 %v4949_v62  ;;  %v4932_v59 = vpop.xlane.xlu1 %4931  ;;  %v4939_v28 = vmul.f32 %v4915_v51, %v4915_v51  ;;  %v4947_v56 = vsub.f32 %v7291_v25, %v4915_v51  ;;  %v5100_v25 = vld [vmem:[%s7471_s15 + $0x38] sm:$0xff] }
0x10d4   : > { %v4936_v1 = vmul.f32 0.03125, %v4932_v59  ;;  %v4929_v55 = vpop.xlane.xlu0 %4928  ;;  %v6312_v34 = vpack.c.bf16 %v5100_v25, %v5099_v60 }
0x10d5   : > { %v4935_v2 = vmul.f32 0.03125, %v4929_v55 }
0x10d6   : > { %v4944_v3 = vsub.f32 %v4936_v1, %v4940_v63  ;;  %6313 = vmatprep.subr.bf16.mxu0 %v6312_v34 }
0x10d7   : > { %v4943_v4 = vsub.f32 %v4935_v2, %v4939_v28  ;;  %6315 = vmatpush3.bf16.msra.mxu0 %v6312_v34 }
0x10d8   : > { %v4952_v7 = vadd.f32 1e-05, %v4944_v3 }
0x10d9   : > { %v4951_v57 = vadd.f32 1e-05, %v4943_v4 }
0x10da   : > { %6443 = vrsqrt.f32 %v4952_v7 }
0x10db   : > { %6445 = vrsqrt.f32 %v4951_v57 }
0x10dc   : > { %v6440_v11 = vpop.eup %6439 }
0x10dd   : > { %v6442_v20 = vpop.eup %6441  ;;  %v4958_v21 = vmul.f32 %v6440_v11, %v4946_v8 }
0x10de   : > { %v4957_v22 = vmul.f32 %v6442_v20, %v4945_v10 }
0x10df   : > { %v4968_v5 = vmul.f32 %v5580_v14, %v4958_v21 }
0x10e0   : > { %v4967_v24 = vmul.f32 %v5580_v14, %v4957_v22 }
0x10e1   : > { %v4978_v32 = vadd.f32 %v5581_v23, %v4968_v5 }
0x10e2   : > { %v4977_v31 = vadd.f32 %v5581_v23, %v4967_v24 }
0x10e4   : > { %v6444_v12 = vpop.eup %6443  ;;  %6168 = vmatprep.mubr.msk.f32.mxu1 %vm672_vm0, %v4977_v31 }
0x10e5   : > { %v6446_v0 = vpop.eup %6445  ;;  %6169 = vmatmul.mubr.msk.f32.vlgmr.msra.gmra.mrb[62].mxu1 %vm672_vm0, %v4978_v32  ;;  %v4960_v33 = vmul.f32 %v6444_v12, %v4948_v9 }
0x10e6   : > { %v4959_v6 = vmul.f32 %v6446_v0, %v4947_v56 }
0x10e7   : > { %v4970_v13 = vmul.f32 %v5580_v14, %v4960_v33 }
0x10e8   : > { %v4969_v15 = vmul.f32 %v5580_v14, %v4959_v6 }
0x10e9   : > { %v4980_v27 = vadd.f32 %v5581_v23, %v4970_v13 }
0x10ea   : > { %v4979_v26 = vadd.f32 %v5581_v23, %v4969_v15 }
0x10ec   : > { %6171 = vmatprep.mubr.msk.f32.mxu1 %vm672_vm0, %v4979_v26 }
0x10ed   : > { %6172 = vmatmul.mubr.msk.f32.gmra.mrb[64].mxu1 %vm672_vm0, %v4980_v27 }
0x11b8   : > { %v6170_v35 = vpop.f32.mrb[62].mxu1 }
0x11b9   : > { %v5076_v36 = vadd.f32 %v6170_v35, %v5582_v29  ;;  %v5070_v30 = vpop.f32.mrb[63].mxu1 }
0x11ba   : > { %v5071_v37 = vadd.f32 %v5582_v29, %v5070_v30 }
0x11bb   : > { %v5090_v39 = vmax.f32 %v5076_v36, 0.0 }
0x11bc   : > { %v5089_v38 = vmax.f32 %v5071_v37, 0.0 }
0x11be   : > { %6190 = vmatprep.mubr.msk.f32.mxu0 %vm5108_vm3, %v5089_v38  ;;  %v5592_v38 = vld [vmem:[%s7473_s17] ss:$0 sm:$0xff] }
0x11bf   : > { %6191 = vmatmul.mubr.msk.f32.vlgmr.msra.gmra.mrb[54].mxu0 %vm5108_vm3, %v5090_v39 }
0x11c0   : > { %v6173_v40 = vpop.f32.mrb[64].mxu1 }
0x11c1   : > { %v5086_v41 = vadd.f32 %v6173_v40, %v5582_v29  ;;  %v5080_v42 = vpop.f32.mrb[65].mxu1 }
0x11c2   : > { %v5081_v43 = vadd.f32 %v5582_v29, %v5080_v42 }
0x11c3   : > { %v5092_v44 = vmax.f32 %v5086_v41, 0.0  ;;  %v5593_v41 = vld [vmem:[%s7474_s18] ss:$0 sm:$0xff] }
0x11c4   : > { %v5091_v16 = vmax.f32 %v5081_v43, 0.0 }
0x11c6   : > { %6193 = vmatprep.mubr.msk.f32.mxu0 %vm5108_vm3, %v5091_v16 }
0x11c7   : > { %6194 = vmatmul.mubr.msk.f32.gmra.mrb[56].mxu0 %vm5108_vm3, %v5092_v44 }
0x1292   : > { %v6192_v18 = vpop.f32.mrb[54].mxu0 }
0x1293   : > { %v5193_v19 = vadd.f32 %v6192_v18, %v5587_v17  ;;  %v5187_v47 = vpop.f32.mrb[55].mxu0 }
0x1294   : > { %v5188_v48 = vadd.f32 %v5587_v17, %v5187_v47 }
0x1295   : > { %v7360_v49 = vadd.f32 %v5193_v19, %v4978_v32 }
0x1296   : > { %v7362_v50 = vadd.f32 %v5188_v48, %v4977_v31 }
0x1297   : > { %v5215_v52 = vsel %vm672_vm0, %v7360_v49, 0.0  ;;  %v5229_v53 = vmul.f32 %v7360_v49, %v7360_v49 }
0x1298   : > { %5216 = vadd.xlane.f32.xlu1 %v5215_v52  ;;  %v5212_v54 = vsel %vm672_vm0, %v7362_v50, 0.0  ;;  %v5228_v58 = vmul.f32 %v7362_v50, %v7362_v50 }
0x1299   : > { %5213 = vadd.xlane.f32.xlu0 %v5212_v54  ;;  %v5235_v62 = vsel %vm672_vm0, %v5229_v53, 0.0 }
0x129a   : > { %v6195_v45 = vpop.f32.mrb[56].mxu0  ;;  %v5232_v59 = vsel %vm672_vm0, %v5228_v58, 0.0 }
0x129b   : > { %v5203_v46 = vadd.f32 %v6195_v45, %v5587_v17  ;;  %v5197_v61 = vpop.f32.mrb[57].mxu0 }
0x129c   : > { %v5198_v51 = vadd.f32 %v5587_v17, %v5197_v61  ;;  %5236 = vadd.xlane.f32.xlu1 %v5235_v62 }
0x129d   : > { %v7374_v63 = vadd.f32 %v5203_v46, %v4980_v27  ;;  %5233 = vadd.xlane.f32.xlu0 %v5232_v59 }
0x129e   : > { %v7376_v1 = vadd.f32 %v5198_v51, %v4979_v26 }
0x129f   : > { %v5221_v55 = vsel %vm672_vm0, %v7374_v63, 0.0  ;;  %v5231_v28 = vmul.f32 %v7374_v63, %v7374_v63 }
0x12a0   : > { %5222 = vadd.xlane.f32.xlu1 %v5221_v55  ;;  %v5218_v2 = vsel %vm672_vm0, %v7376_v1, 0.0  ;;  %v5230_v3 = vmul.f32 %v7376_v1, %v7376_v1 }
0x12a1   : > { %5219 = vadd.xlane.f32.xlu0 %v5218_v2  ;;  %v5241_v4 = vsel %vm672_vm0, %v5231_v28, 0.0 }
0x12a2   : > { %v5238_v7 = vsel %vm672_vm0, %v5230_v3, 0.0 }
0x12a4   : > { %5242 = vadd.xlane.f32.xlu1 %v5241_v4 }
0x12a5   : > { %5239 = vadd.xlane.f32.xlu0 %v5238_v7 }
0x1325   : > { %v5217_v57 = vpop.xlane.xlu1 %5216 }
0x1326   : > { %v5225_v8 = vmul.f32 0.03125, %v5217_v57  ;;  %v5214_v11 = vpop.xlane.xlu0 %5213 }
0x1327   : > { %v5224_v10 = vmul.f32 0.03125, %v5214_v11 }
0x1328   : > { %v5249_v20 = vmul.f32 %v5225_v8, %v5225_v8  ;;  %v5257_v36 = vsub.f32 %v7360_v49, %v5225_v8 }
0x1329   : > { %v5237_v14 = vpop.xlane.xlu1 %5236  ;;  %v5248_v23 = vmul.f32 %v5224_v10, %v5224_v10  ;;  %v5256_v37 = vsub.f32 %v7362_v50, %v5224_v10 }
0x132a   : > { %v5245_v21 = vmul.f32 0.03125, %v5237_v14  ;;  %v5234_v22 = vpop.xlane.xlu0 %5233 }
0x132b   : > { %v5244_v5 = vmul.f32 0.03125, %v5234_v22 }
0x132c   : > { %v5253_v24 = vsub.f32 %v5245_v21, %v5249_v20 }
0x132d   : > { %v5252_v31 = vsub.f32 %v5244_v5, %v5248_v23  ;;  %v5223_v9 = vpop.xlane.xlu1 %5222 }
0x132e   : > { %v5261_v32 = vadd.f32 1e-05, %v5253_v24  ;;  %v5227_v12 = vmul.f32 0.03125, %v5223_v9  ;;  %v5220_v56 = vpop.xlane.xlu0 %5219 }
0x132f   : > { %v5260_v0 = vadd.f32 1e-05, %v5252_v31  ;;  %v5226_v33 = vmul.f32 0.03125, %v5220_v56 }
0x1330   : > { %6447 = vrsqrt.f32 %v5261_v32  ;;  %v5251_v13 = vmul.f32 %v5227_v12, %v5227_v12  ;;  %v5259_v18 = vsub.f32 %v7374_v63, %v5227_v12 }
0x1331   : > { %6449 = vrsqrt.f32 %v5260_v0  ;;  %v5243_v6 = vpop.xlane.xlu1 %5242  ;;  %v5250_v27 = vmul.f32 %v5226_v33, %v5226_v33  ;;  %v5258_v47 = vsub.f32 %v7376_v1, %v5226_v33 }
0x1332   : > { %v5247_v15 = vmul.f32 0.03125, %v5243_v6  ;;  %v5240_v26 = vpop.xlane.xlu0 %5239 }
0x1333   : > { %v5246_v60 = vmul.f32 0.03125, %v5240_v26 }
0x1334   : > { %v5255_v25 = vsub.f32 %v5247_v15, %v5251_v13 }
0x1335   : > { %v5254_v34 = vsub.f32 %v5246_v60, %v5250_v27 }
0x1336   : > { %v5263_v29 = vadd.f32 1e-05, %v5255_v25 }
0x1337   : > { %v5262_v35 = vadd.f32 1e-05, %v5254_v34 }
0x1338   : > { %6451 = vrsqrt.f32 %v5263_v29 }
0x1339   : > { %6453 = vrsqrt.f32 %v5262_v35 }
0x133a   : > { %v6448_v30 = vpop.eup %6447 }
0x133b   : > { %v6450_v39 = vpop.eup %6449  ;;  %v5269_v40 = vmul.f32 %v6448_v30, %v5257_v36 }
0x133c   : > { %v5268_v42 = vmul.f32 %v6450_v39, %v5256_v37 }
0x133d   : > { %v5279_v43 = vmul.f32 %v5592_v38, %v5269_v40 }
0x133e   : > { %v5278_v16 = vmul.f32 %v5592_v38, %v5268_v42 }
0x133f   : > { %v5289_v44 = vadd.f32 %v5593_v41, %v5279_v43 }
0x1340   : > { %v5288_v17 = vadd.f32 %v5593_v41, %v5278_v16 }
0x1341   : > { %5293 = vst.msk [vmem:[%s628_s23 + $0x8] sm:$0xff] %vm672_vm0, %v5289_v44 }
0x1342   : > { %v6452_v19 = vpop.eup %6451  ;;  %5292 = vst.msk [vmem:[%s628_s23] sm:$0xff] %vm672_vm0, %v5288_v17 }
0x1343   : > { %v6454_v48 = vpop.eup %6453  ;;  %v5271_v49 = vmul.f32 %v6452_v19, %v5259_v18 }
0x1344   : > { %v5270_v50 = vmul.f32 %v6454_v48, %v5258_v47 }
0x1345   : > { %v5281_v52 = vmul.f32 %v5592_v38, %v5271_v49 }
0x1346   : > { %v5280_v53 = vmul.f32 %v5592_v38, %v5270_v50 }
0x1347   : > { %v5291_v54 = vadd.f32 %v5593_v41, %v5281_v52 }
0x1348   : > { %v5290_v58 = vadd.f32 %v5593_v41, %v5280_v53 }
0x1349   : > { %5295 = vst.msk [vmem:[%s628_s23 + $0x18] sm:$0xff] %vm672_vm0, %v5291_v54 }
0x134a   : > { %5294 = vst.msk [vmem:[%s628_s23 + $0x10] sm:$0xff] %vm672_vm0, %v5290_v58 }
0x134b   : > { %6480 = shalt.err (!%p6477_p3)
}
0x134c   : > { %s6481_s2 = scalar_lea.hbm %s7407_s26, 512  ;;  %s6485_s3 = scalar_lea.hbm %s7505_s28, 1024 }
0x134d   : > { %p6482_p4 = scmp.ne.s32.totalorder %s7407_s26, %s6481_s2  ;;  %p6486_p9 = scmp.lt.u32.totalorder %s7407_s26, %s7505_s28 }
0x134e   : > { %p6487_p10 = scmp.lt.u32.totalorder %s6485_s3, %s6481_s2  ;;  %p6489_p12 = scmp.lt.u32.totalorder %s6481_s2, %s7407_s26 }
0x134f   : > { %p6483_p7 = pnand %p6482_p4, %p6674_p5 }
0x1350   : > { %p6488_p11 = por %p6487_p10, %p6486_p9 }
0x1351   : > { %p6484_p8 = pneg %p6483_p7 }
0x1352   : > { %p6490_p13 = por %p6489_p12, %p6488_p11 }
0x1354   : > { %p6491_p0 = pnand %p6490_p13, %p6484_p8 }
0x1356   : > { %6494 = shalt.err (!%p6491_p0)
}
0x1357   : > { %s6534_s22 = smov 128   ;;  %s6535_s19 = smov 8  }
0x1358   : > { %6332 = dma.vmem_to_hbm [thread:$0]  (%p6674_p5), %s7409_s20, 512, %s7407_s26, %s7415_s1, %s6534_s22, %s6534_s22, %s6535_s19  }
0x1359 PF: > { %s7506_s25 = sld [smem:[#allocation7_spill]]  ;;  %s7507_s23 = sld [smem:[#allocation5_spill]] }
0x135f   : > { %p6338_p1 = scmp.ge.s32.totalorder %s7506_s25, 2  ;;  %s5325_s27 = sand.u32 1, %s7507_s23  }
0x1360   : > { %s5326_s2 = scalar_lea.sflag [#allocation3], %s5325_s27 }
0x1361   : > { %p6335_p2 = pnand %p6338_p1, %p6678_p6 }
0x1363   : > { %6512 = dma.done.wait (!%p6335_p2), %s5326_s2, 512  }
0x1364   : > { %6514 = vsyncadd (!%p6335_p2), %s5326_s2, 4294966784  ;;  %s7509_s21 = sld [smem:[#allocation8_spill]]  ;;  %s7510_s3 = sld [smem:[#allocation6_spill]] }
0x1365   : > { %s7511_s20 = sld [smem:[#allocation9_spill]]  ;;  %s7512_s0 = smov %s6521_s30 }
0x136a   : > { %p29_p3 = scmp.ge.s32.totalorder %s7509_s21, 4   ;;  %s7513_s30 = smov %s7510_s3 }
0x136c   :  { %31 = sbr.rel (!%p29_p3) target bundleno = 9 (0x9), region = 158 }
0x1373   :  { %5331 = vsyncpa [#allocation3], 1 }
0x1374   :  { %5333 = vsyncpa [#allocation3 + $0x1], 1 }

</bundles_post_ra>
